<compile_context>
chip_gen: v7x
topology: tpu7x:2x2x1
jax: 0.10.0
libtpu: 0.0.40
codegen_flags: <defaults>
</compile_context>

<pallas_src>
import functools

import jax
import jax.numpy as jnp
from jax.experimental import pallas as pl
from jax.experimental.pallas import tpu as pltpu

LANE = 128
MAX_TILE_ROWS = 1024          # (1024, 128) f32 = 512 KiB per stream per buffer
NSUMS = 9                     # scalar reductions per tile

# Descending log-spaced OHEM histogram edges (strict '>' comparisons).  BCE is
# clamped at 100, so everything above 64 lands in the first bucket; the last
# edge (0.0) makes the final bucket "every non-zero negative-BCE value", which
# makes the "take all negatives" case exact.
HIST_EDGES = (64.0, 32.0, 16.0, 8.0, 4.0, 2.0, 1.0, 0.5,
              0.25, 0.125, 0.0625, 0.03125, 0.015625,
              0.0078125, 0.00390625, 0.0)
NBINS = len(HIST_EDGES)
STATS_ROWS = NSUMS + 2 * NBINS      # 9 + 32 = 41


def _round_up(x, m):
    return ((x + m - 1) // m) * m


# ----------------------------- kernel math -----------------------------------
def _bce_with_logits(x, y):
    # torch F.binary_cross_entropy(sigmoid(x), y) for y in {0, 1}, evaluated
    # from logits with the single-softplus identity
    #   bce = max(x, 0) - x*y + log(1 + exp(-|x|))
    # torch's per-term log clamp at -100 is replicated by capping the (single
    # active) term at 100.
    t = jnp.log(1.0 + jnp.exp(-jnp.abs(x)))
    return jnp.minimum(jnp.maximum(x, 0.0) - x * y + t, 100.0)


def _smooth_l1(x, y):
    # torch F.smooth_l1_loss, beta = 1.0, reduction='none'
    d = jnp.abs(x - y)
    return jnp.where(d < 1.0, 0.5 * d * d, d - 0.5)


def drrg_map_kernel(pred_ref, gtext_ref, gcenter_ref, gmask_ref,
                    gtop_ref, gbot_ref, gsin_ref, gcos_ref, stats_ref):
    """One (image, row-tile) grid step.

    Emits a (STATS_ROWS, LANE) lane-dense block of per-lane row-partials:
      0 positive (text_mask)    1 negative            2 bce_text * positive
      3 bce_center * positive   4 bce_center * negative 5 center_mask
      6 height numerator        7 sin numerator        8 cos numerator
      9 .. 9+NBINS-1            cumulative counts of neg_loss >  HIST_EDGES[b]
      9+NBINS .. STATS_ROWS-1   cumulative sums of neg_loss where > HIST_EDGES[b]
    """
    def rsum(x):
        return jnp.sum(x, axis=0, keepdims=True)       # rows -> (1, LANE)

    # ---- text BCE + OHEM histogram (streams loaded just before first use) ----
    gt_text = gtext_ref[0]
    gt_mask = gmask_ref[0]
    positive = gt_text * gt_mask                       # text_mask
    negative = gt_mask - positive                      # (1 - gt_text) * gt_mask

    pt = pred_ref[0, 0]
    bce_text = _bce_with_logits(pt, gt_text)
    neg_loss = bce_text * negative

    rows = [rsum(positive), rsum(negative), rsum(bce_text * positive)]

    cnt_rows, sum_rows = [], []
    for edge in HIST_EDGES:
        sel = neg_loss > edge
        cnt_rows.append(rsum(jnp.where(sel, 1.0, 0.0)))
        sum_rows.append(rsum(jnp.where(sel, neg_loss, 0.0)))

    # ---- center BCE ----
    gt_center = gcenter_ref[0]
    pc = pred_ref[0, 1]
    bce_center = _bce_with_logits(pc, gt_center)
    rows.append(rsum(bce_center * positive))
    rows.append(rsum(bce_center * negative))

    center_mask = gt_center * gt_mask
    rows.append(rsum(center_mask))

    # ---- geometry (height / sin / cos) ----
    gt_top = gtop_ref[0]
    gt_bot = gbot_ref[0]
    ptop = pred_ref[0, 4]
    pbot = pred_ref[0, 5]
    loss_top = _smooth_l1(ptop * pl.reciprocal(gt_top + 0.01, approx=True), 1.0)
    loss_bot = _smooth_l1(pbot * pl.reciprocal(gt_bot + 0.01, approx=True), 1.0)
    rows.append(rsum(jnp.log(gt_top + gt_bot + 1.0)
                     * (loss_top + loss_bot) * center_mask))

    psin = pred_ref[0, 2]
    pcos = pred_ref[0, 3]
    scale = jax.lax.rsqrt(psin * psin + pcos * pcos + 1e-8)
    rows.append(rsum(_smooth_l1(psin * scale, gsin_ref[0]) * center_mask))
    rows.append(rsum(_smooth_l1(pcos * scale, gcos_ref[0]) * center_mask))

    stats_ref[0, 0] = jnp.concatenate(rows + cnt_rows + sum_rows, axis=0)


# --------------------------- pallas wrapper -----------------------------------
def _choose_tiling(hw):
    rows = -(-hw // LANE)
    if rows <= MAX_TILE_ROWS:
        return rows, rows                      # single row-tile per image
    for t in range(MAX_TILE_ROWS, 127, -8):    # multiple-of-8 exact divisors
        if rows % t == 0:
            return t, rows
    return MAX_TILE_ROWS, _round_up(rows, MAX_TILE_ROWS)   # rare pad fallback


def _flatten_rows(x, hw, rows_padded):
    # (..., H, W) -> (..., rows_padded, 128); free reshape unless padding is
    # actually required (hw % 128 != 0 or ragged tiling fallback).
    lead = x.shape[:-2]
    x = x.astype(jnp.float32).reshape(lead + (hw,))
    pad = rows_padded * LANE - hw
    if pad:
        x = jnp.pad(x, [(0, 0)] * len(lead) + [(0, pad)])  # zeros: masks are 0
    return x.reshape(lead + (rows_padded, LANE))


def _map_loss_call(pred4, gt4s, tile_rows):
    n, _, rows, _ = pred4.shape
    num_tiles = rows // tile_rows
    pred_spec = pl.BlockSpec((1, 6, tile_rows, LANE), lambda b, i: (b, 0, i, 0))
    gt_spec = pl.BlockSpec((1, tile_rows, LANE), lambda b, i: (b, i, 0))
    stats_spec = pl.BlockSpec((1, 1, STATS_ROWS, LANE), lambda b, i: (b, i, 0, 0))
    return pl.pallas_call(
        drrg_map_kernel,
        grid=(n, num_tiles),
        in_specs=[pred_spec] + [gt_spec] * 7,
        out_specs=stats_spec,
        out_shape=jax.ShapeDtypeStruct((n, num_tiles, STATS_ROWS, LANE),
                                       jnp.float32),
        compiler_params=pltpu.CompilerParams(
            dimension_semantics=("parallel", "parallel"),
            vmem_limit_bytes=32 * 1024 * 1024),
    )(pred4, *gt4s)


# --------------------------- OHEM threshold select ----------------------------
def _ohem_topk_sum(cnt_ge, sum_ge, neg_count):
    # TODO(synk): dynamic-k torch.topk has no Pallas/TPU primitive; selection
    # uses the in-kernel cumulative log histogram.  Exact except for a
    # mean-value correction inside the single partially-taken boundary bin.
    kf = neg_count.astype(jnp.float32)
    zero = jnp.zeros((1,), jnp.float32)
    cnt_above = jnp.concatenate([zero, cnt_ge[:-1]])
    sum_above = jnp.concatenate([zero, sum_ge[:-1]])
    bin_cnt = cnt_ge - cnt_above
    bin_sum = sum_ge - sum_above
    satisfied = cnt_ge >= kf
    j = jnp.argmax(satisfied)                       # first bin reaching k
    need = jnp.clip(kf - cnt_above[j], 0.0, bin_cnt[j])
    bin_mean = bin_sum[j] / jnp.maximum(bin_cnt[j], 1.0)
    approx = sum_above[j] + need * bin_mean
    # If even the "> 0" bucket has fewer than k entries, every non-zero value
    # is selected (extra zeros contribute nothing) -> exact.
    return jnp.where(satisfied[-1], approx, sum_ge[-1])


# ------------------------------ forward ---------------------------------------
def _forward_impl(pred_maps, gts, gcn_pred, gt_labels, *, ohem_ratio):
    gt_text, gt_center, gt_mask, gt_top, gt_bot, gt_sin, gt_cos = gts
    n, c, h, w = pred_maps.shape
    assert c == 6
    hw = h * w
    tile_rows, rows_padded = _choose_tiling(hw)

    pred4 = _flatten_rows(pred_maps, hw, rows_padded)        # (N, 6, rows, 128)
    gt4s = [_flatten_rows(g, hw, rows_padded)
            for g in (gt_text, gt_center, gt_mask, gt_top, gt_bot,
                      gt_sin, gt_cos)]                       # (N, rows, 128) x7

    stats = _map_loss_call(pred4, gt4s, tile_rows)
    sums = jnp.sum(stats, axis=(0, 1, 3))                    # (STATS_ROWS,)

    pos_sum, neg_sum = sums[0], sums[1]
    bce_pos_sum, c_pos_sum, c_neg_sum = sums[2], sums[3], sums[4]
    center_sum, height_sum, sin_sum, cos_sum = sums[5], sums[6], sums[7], sums[8]
    cnt_ge = sums[NSUMS:NSUMS + NBINS]
    sum_ge = sums[NSUMS + NBINS:]

    # ---- balanced BCE (OHEM), fully on-device, static shapes ----
    pos_count = jnp.round(pos_sum).astype(jnp.int32)
    neg_avail = jnp.round(neg_sum).astype(jnp.int32)
    has_pos = pos_count > 0
    neg_count = jnp.where(
        has_pos,
        jnp.minimum(neg_avail,
                    jnp.floor(pos_count.astype(jnp.float32) * ohem_ratio)
                    .astype(jnp.int32)),
        jnp.int32(100))
    positive_loss = jnp.where(has_pos, bce_pos_sum, 0.0)
    topk_sum = _ohem_topk_sum(cnt_ge, sum_ge, neg_count)
    denom = (pos_count + neg_count).astype(jnp.float32) + 1e-5
    loss_text = (positive_loss + topk_sum) / denom

    # ---- center loss ----
    loss_center_positive = jnp.where(
        has_pos, c_pos_sum / jnp.where(has_pos, pos_sum, 1.0), 0.0)
    has_neg = neg_sum > 0
    # guard vs reference: torch divides unguarded and NaNs when neg_sum == 0
    loss_center_negative = jnp.where(
        has_neg, c_neg_sum / jnp.where(has_neg, neg_sum, 1.0), 0.0)
    loss_center = loss_center_positive + 0.5 * loss_center_negative

    # ---- geometry losses ----
    has_center = jnp.round(center_sum) > 0
    safe_center = jnp.where(has_center, center_sum, 1.0)
    loss_height = jnp.where(has_center, height_sum / safe_center, 0.0)
    loss_sin = jnp.where(has_center, sin_sum / safe_center, 0.0)
    loss_cos = jnp.where(has_center, cos_sum / safe_center, 0.0)

    # ---- GCN cross-entropy (tiny (M, 2): plain jnp, no kernel launch) ----
    labels_flat = gt_labels.reshape(-1).astype(jnp.int32)
    log_probs = jax.nn.log_softmax(gcn_pred.astype(jnp.float32), axis=-1)
    onehot = jax.nn.one_hot(labels_flat, gcn_pred.shape[1], dtype=jnp.float32)
    loss_gcn = -jnp.mean(jnp.sum(log_probs * onehot, axis=-1))

    loss = (loss_text + loss_center + loss_height + loss_sin + loss_cos
            + loss_gcn)
    return dict(loss=loss, loss_text=loss_text, loss_center=loss_center,
                loss_height=loss_height, loss_sin=loss_sin, loss_cos=loss_cos,
                loss_gcn=loss_gcn)


class DRRGLossPallas:
    """JAX/Pallas re-implementation of toddleocr DRRGLoss (downsample_ratio=1.0)."""

    def __init__(self, ohem_ratio=3.0):
        self.ohem_ratio = float(ohem_ratio)
        self.downsample_ratio = 1.0
        self._forward = jax.jit(
            functools.partial(_forward_impl, ohem_ratio=self.ohem_ratio))

    def __call__(self, preds, labels):
        pred_maps, gcn_data = preds
        gcn_pred, gt_labels = gcn_data
        # TODO(synk): bitmasks2tensor / downsample_ratio != 1.0 rescale path is
        # not implemented; gt maps are assumed to be dense (N, H, W) arrays.
        gts = tuple(jnp.asarray(g) for g in labels[1:8])
        return self._forward(jnp.asarray(pred_maps, jnp.float32), gts,
                             jnp.asarray(gcn_pred, jnp.float32),
                             jnp.asarray(gt_labels))


# ------------------------------ demo ------------------------------------------
if __name__ == "__main__":
    key = jax.random.PRNGKey(0)
    ks = jax.random.split(key, 9)
    N, H, W = 2, 16, 16

    pred_maps = jax.random.normal(ks[0], (N, 6, H, W), jnp.float32)

    gt_text = (jax.random.uniform(ks[1], (N, H, W)) > 0.5).astype(jnp.float32)
    gt_center = ((jax.random.uniform(ks[2], (N, H, W)) > 0.6).astype(jnp.float32)
                 * gt_text)
    gt_mask = (jax.random.uniform(ks[3], (N, H, W)) > 0.1).astype(jnp.float32)
    gt_top = jax.random.uniform(ks[4], (N, H, W), minval=1.0, maxval=10.0)
    gt_bot = jax.random.uniform(ks[5], (N, H, W), minval=1.0, maxval=10.0)
    theta = jax.random.uniform(ks[6], (N, H, W), minval=-3.14, maxval=3.14)
    gt_sin = jnp.sin(theta)
    gt_cos = jnp.cos(theta)

    # gcn data: (M, 2) logits, labels of shape (m, n) with m*n = M
    M = 8
    gcn_pred = jax.random.normal(ks[7], (M, 2), jnp.float32)
    gt_labels = jax.random.randint(ks[8], (2, 4), 0, 2, dtype=jnp.int32)

    labels = [None, gt_text, gt_center, gt_mask, gt_top, gt_bot, gt_sin, gt_cos]
    preds = (pred_maps, (gcn_pred, gt_labels))

    loss_fn = DRRGLossPallas(ohem_ratio=3.0)
    results = loss_fn(preds, labels)
    jax.block_until_ready(results["loss"])
    assert bool(jnp.isfinite(results["loss"]))
    print("KERNEL_OK")
</pallas_src>

<mosaic_0001>
module attributes {stable_mosaic.version = 11 : i64} {
  func.func @drrg_map_kernel(%arg0: i32, %arg1: i32, %arg2: memref<1x6x2x128xf32, #tpu.memory_space<vmem>>, %arg3: memref<1x2x128xf32, #tpu.memory_space<vmem>>, %arg4: memref<1x2x128xf32, #tpu.memory_space<vmem>>, %arg5: memref<1x2x128xf32, #tpu.memory_space<vmem>>, %arg6: memref<1x2x128xf32, #tpu.memory_space<vmem>>, %arg7: memref<1x2x128xf32, #tpu.memory_space<vmem>>, %arg8: memref<1x2x128xf32, #tpu.memory_space<vmem>>, %arg9: memref<1x2x128xf32, #tpu.memory_space<vmem>>, %arg10: memref<1x1x41x128xf32, #tpu.memory_space<vmem>>) attributes {dimension_semantics = [#tpu.dimension_semantics<parallel>, #tpu.dimension_semantics<parallel>], iteration_bounds = array<i64: 2, 1>, scalar_prefetch = 0 : i64, scratch_operands = 0 : i64, tpu.core_type = #tpu.core_type<tc>, window_params = [{transform_indices = @transform_0, window_bounds = array<i64: 1, 6, 2, 128>}, {transform_indices = @transform_1, window_bounds = array<i64: 1, 2, 128>}, {transform_indices = @transform_2, window_bounds = array<i64: 1, 2, 128>}, {transform_indices = @transform_3, window_bounds = array<i64: 1, 2, 128>}, {transform_indices = @transform_4, window_bounds = array<i64: 1, 2, 128>}, {transform_indices = @transform_5, window_bounds = array<i64: 1, 2, 128>}, {transform_indices = @transform_6, window_bounds = array<i64: 1, 2, 128>}, {transform_indices = @transform_7, window_bounds = array<i64: 1, 2, 128>}, {transform_indices = @transform_8, window_bounds = array<i64: 1, 1, 41, 128>}]} {
    %c0 = arith.constant 0 : index
    %c0_0 = arith.constant 0 : index
    %c0_1 = arith.constant 0 : index
    %0 = vector.load %arg3[%c0, %c0_0, %c0_1] : memref<1x2x128xf32, #tpu.memory_space<vmem>>, vector<1x2x128xf32>
    %1 = vector.shape_cast %0 : vector<1x2x128xf32> to vector<2x128xf32>
    %c0_2 = arith.constant 0 : index
    %c0_3 = arith.constant 0 : index
    %c0_4 = arith.constant 0 : index
    %2 = vector.load %arg5[%c0_2, %c0_3, %c0_4] : memref<1x2x128xf32, #tpu.memory_space<vmem>>, vector<1x2x128xf32>
    %3 = vector.shape_cast %2 : vector<1x2x128xf32> to vector<2x128xf32>
    %4 = arith.mulf %1, %3 : vector<2x128xf32>
    %5 = arith.subf %3, %4 : vector<2x128xf32>
    %c0_5 = arith.constant 0 : index
    %c0_6 = arith.constant 0 : index
    %c0_7 = arith.constant 0 : index
    %c0_8 = arith.constant 0 : index
    %6 = vector.load %arg2[%c0_5, %c0_6, %c0_7, %c0_8] : memref<1x6x2x128xf32, #tpu.memory_space<vmem>>, vector<1x1x2x128xf32>
    %7 = vector.shape_cast %6 : vector<1x1x2x128xf32> to vector<2x128xf32>
    %8 = math.absf %7 : vector<2x128xf32>
    %cst = arith.constant 0.000000e+00 : f32
    %9 = vector.broadcast %cst : f32 to vector<2x128xf32>
    %10 = arith.subf %9, %8 : vector<2x128xf32>
    %11 = math.exp %10 : vector<2x128xf32>
    %cst_9 = arith.constant 1.000000e+00 : f32
    %12 = vector.broadcast %cst_9 : f32 to vector<2x128xf32>
    %13 = arith.addf %12, %11 : vector<2x128xf32>
    %14 = math.log %13 : vector<2x128xf32>
    %cst_10 = arith.constant 0.000000e+00 : f32
    %15 = vector.broadcast %cst_10 : f32 to vector<2x128xf32>
    %16 = arith.maximumf %7, %15 : vector<2x128xf32>
    %17 = arith.mulf %7, %1 : vector<2x128xf32>
    %18 = arith.subf %16, %17 : vector<2x128xf32>
    %19 = arith.addf %18, %14 : vector<2x128xf32>
    %cst_11 = arith.constant 1.000000e+02 : f32
    %20 = vector.broadcast %cst_11 : f32 to vector<2x128xf32>
    %21 = arith.minimumf %19, %20 : vector<2x128xf32>
    %22 = arith.mulf %21, %5 : vector<2x128xf32>
    %cst_12 = arith.constant dense<0.000000e+00> : vector<128xf32>
    %23 = vector.multi_reduction <add>, %4, %cst_12 [0] : vector<2x128xf32> to vector<128xf32>
    %24 = vector.shape_cast %23 : vector<128xf32> to vector<1x128xf32>
    %cst_13 = arith.constant dense<0.000000e+00> : vector<128xf32>
    %25 = vector.multi_reduction <add>, %5, %cst_13 [0] : vector<2x128xf32> to vector<128xf32>
    %26 = vector.shape_cast %25 : vector<128xf32> to vector<1x128xf32>
    %27 = arith.mulf %21, %4 : vector<2x128xf32>
    %cst_14 = arith.constant dense<0.000000e+00> : vector<128xf32>
    %28 = vector.multi_reduction <add>, %27, %cst_14 [0] : vector<2x128xf32> to vector<128xf32>
    %29 = vector.shape_cast %28 : vector<128xf32> to vector<1x128xf32>
    %cst_15 = arith.constant 6.400000e+01 : f32
    %30 = vector.broadcast %cst_15 : f32 to vector<2x128xf32>
    %31 = arith.cmpf ogt, %22, %30 : vector<2x128xf32>
    %cst_16 = arith.constant 1.000000e+00 : f32
    %cst_17 = arith.constant 0.000000e+00 : f32
    %32 = vector.broadcast %cst_16 : f32 to vector<2x128xf32>
    %33 = vector.broadcast %cst_17 : f32 to vector<2x128xf32>
    %34 = arith.select %31, %32, %33 : vector<2x128xi1>, vector<2x128xf32>
    %cst_18 = arith.constant dense<0.000000e+00> : vector<128xf32>
    %35 = vector.multi_reduction <add>, %34, %cst_18 [0] : vector<2x128xf32> to vector<128xf32>
    %36 = vector.shape_cast %35 : vector<128xf32> to vector<1x128xf32>
    %cst_19 = arith.constant 0.000000e+00 : f32
    %37 = vector.broadcast %cst_19 : f32 to vector<2x128xf32>
    %38 = arith.select %31, %22, %37 : vector<2x128xi1>, vector<2x128xf32>
    %cst_20 = arith.constant dense<0.000000e+00> : vector<128xf32>
    %39 = vector.multi_reduction <add>, %38, %cst_20 [0] : vector<2x128xf32> to vector<128xf32>
    %40 = vector.shape_cast %39 : vector<128xf32> to vector<1x128xf32>
    %cst_21 = arith.constant 3.200000e+01 : f32
    %41 = vector.broadcast %cst_21 : f32 to vector<2x128xf32>
    %42 = arith.cmpf ogt, %22, %41 : vector<2x128xf32>
    %cst_22 = arith.constant 1.000000e+00 : f32
    %cst_23 = arith.constant 0.000000e+00 : f32
    %43 = vector.broadcast %cst_22 : f32 to vector<2x128xf32>
    %44 = vector.broadcast %cst_23 : f32 to vector<2x128xf32>
    %45 = arith.select %42, %43, %44 : vector<2x128xi1>, vector<2x128xf32>
    %cst_24 = arith.constant dense<0.000000e+00> : vector<128xf32>
    %46 = vector.multi_reduction <add>, %45, %cst_24 [0] : vector<2x128xf32> to vector<128xf32>
    %47 = vector.shape_cast %46 : vector<128xf32> to vector<1x128xf32>
    %cst_25 = arith.constant 0.000000e+00 : f32
    %48 = vector.broadcast %cst_25 : f32 to vector<2x128xf32>
    %49 = arith.select %42, %22, %48 : vector<2x128xi1>, vector<2x128xf32>
    %cst_26 = arith.constant dense<0.000000e+00> : vector<128xf32>
    %50 = vector.multi_reduction <add>, %49, %cst_26 [0] : vector<2x128xf32> to vector<128xf32>
    %51 = vector.shape_cast %50 : vector<128xf32> to vector<1x128xf32>
    %cst_27 = arith.constant 1.600000e+01 : f32
    %52 = vector.broadcast %cst_27 : f32 to vector<2x128xf32>
    %53 = arith.cmpf ogt, %22, %52 : vector<2x128xf32>
    %cst_28 = arith.constant 1.000000e+00 : f32
    %cst_29 = arith.constant 0.000000e+00 : f32
    %54 = vector.broadcast %cst_28 : f32 to vector<2x128xf32>
    %55 = vector.broadcast %cst_29 : f32 to vector<2x128xf32>
    %56 = arith.select %53, %54, %55 : vector<2x128xi1>, vector<2x128xf32>
    %cst_30 = arith.constant dense<0.000000e+00> : vector<128xf32>
    %57 = vector.multi_reduction <add>, %56, %cst_30 [0] : vector<2x128xf32> to vector<128xf32>
    %58 = vector.shape_cast %57 : vector<128xf32> to vector<1x128xf32>
    %cst_31 = arith.constant 0.000000e+00 : f32
    %59 = vector.broadcast %cst_31 : f32 to vector<2x128xf32>
    %60 = arith.select %53, %22, %59 : vector<2x128xi1>, vector<2x128xf32>
    %cst_32 = arith.constant dense<0.000000e+00> : vector<128xf32>
    %61 = vector.multi_reduction <add>, %60, %cst_32 [0] : vector<2x128xf32> to vector<128xf32>
    %62 = vector.shape_cast %61 : vector<128xf32> to vector<1x128xf32>
    %cst_33 = arith.constant 8.000000e+00 : f32
    %63 = vector.broadcast %cst_33 : f32 to vector<2x128xf32>
    %64 = arith.cmpf ogt, %22, %63 : vector<2x128xf32>
    %cst_34 = arith.constant 1.000000e+00 : f32
    %cst_35 = arith.constant 0.000000e+00 : f32
    %65 = vector.broadcast %cst_34 : f32 to vector<2x128xf32>
    %66 = vector.broadcast %cst_35 : f32 to vector<2x128xf32>
    %67 = arith.select %64, %65, %66 : vector<2x128xi1>, vector<2x128xf32>
    %cst_36 = arith.constant dense<0.000000e+00> : vector<128xf32>
    %68 = vector.multi_reduction <add>, %67, %cst_36 [0] : vector<2x128xf32> to vector<128xf32>
    %69 = vector.shape_cast %68 : vector<128xf32> to vector<1x128xf32>
    %cst_37 = arith.constant 0.000000e+00 : f32
    %70 = vector.broadcast %cst_37 : f32 to vector<2x128xf32>
    %71 = arith.select %64, %22, %70 : vector<2x128xi1>, vector<2x128xf32>
    %cst_38 = arith.constant dense<0.000000e+00> : vector<128xf32>
    %72 = vector.multi_reduction <add>, %71, %cst_38 [0] : vector<2x128xf32> to vector<128xf32>
    %73 = vector.shape_cast %72 : vector<128xf32> to vector<1x128xf32>
    %cst_39 = arith.constant 4.000000e+00 : f32
    %74 = vector.broadcast %cst_39 : f32 to vector<2x128xf32>
    %75 = arith.cmpf ogt, %22, %74 : vector<2x128xf32>
    %cst_40 = arith.constant 1.000000e+00 : f32
    %cst_41 = arith.constant 0.000000e+00 : f32
    %76 = vector.broadcast %cst_40 : f32 to vector<2x128xf32>
    %77 = vector.broadcast %cst_41 : f32 to vector<2x128xf32>
    %78 = arith.select %75, %76, %77 : vector<2x128xi1>, vector<2x128xf32>
    %cst_42 = arith.constant dense<0.000000e+00> : vector<128xf32>
    %79 = vector.multi_reduction <add>, %78, %cst_42 [0] : vector<2x128xf32> to vector<128xf32>
    %80 = vector.shape_cast %79 : vector<128xf32> to vector<1x128xf32>
    %cst_43 = arith.constant 0.000000e+00 : f32
    %81 = vector.broadcast %cst_43 : f32 to vector<2x128xf32>
    %82 = arith.select %75, %22, %81 : vector<2x128xi1>, vector<2x128xf32>
    %cst_44 = arith.constant dense<0.000000e+00> : vector<128xf32>
    %83 = vector.multi_reduction <add>, %82, %cst_44 [0] : vector<2x128xf32> to vector<128xf32>
    %84 = vector.shape_cast %83 : vector<128xf32> to vector<1x128xf32>
    %cst_45 = arith.constant 2.000000e+00 : f32
    %85 = vector.broadcast %cst_45 : f32 to vector<2x128xf32>
    %86 = arith.cmpf ogt, %22, %85 : vector<2x128xf32>
    %cst_46 = arith.constant 1.000000e+00 : f32
    %cst_47 = arith.constant 0.000000e+00 : f32
    %87 = vector.broadcast %cst_46 : f32 to vector<2x128xf32>
    %88 = vector.broadcast %cst_47 : f32 to vector<2x128xf32>
    %89 = arith.select %86, %87, %88 : vector<2x128xi1>, vector<2x128xf32>
    %cst_48 = arith.constant dense<0.000000e+00> : vector<128xf32>
    %90 = vector.multi_reduction <add>, %89, %cst_48 [0] : vector<2x128xf32> to vector<128xf32>
    %91 = vector.shape_cast %90 : vector<128xf32> to vector<1x128xf32>
    %cst_49 = arith.constant 0.000000e+00 : f32
    %92 = vector.broadcast %cst_49 : f32 to vector<2x128xf32>
    %93 = arith.select %86, %22, %92 : vector<2x128xi1>, vector<2x128xf32>
    %cst_50 = arith.constant dense<0.000000e+00> : vector<128xf32>
    %94 = vector.multi_reduction <add>, %93, %cst_50 [0] : vector<2x128xf32> to vector<128xf32>
    %95 = vector.shape_cast %94 : vector<128xf32> to vector<1x128xf32>
    %cst_51 = arith.constant 1.000000e+00 : f32
    %96 = vector.broadcast %cst_51 : f32 to vector<2x128xf32>
    %97 = arith.cmpf ogt, %22, %96 : vector<2x128xf32>
    %cst_52 = arith.constant 1.000000e+00 : f32
    %cst_53 = arith.constant 0.000000e+00 : f32
    %98 = vector.broadcast %cst_52 : f32 to vector<2x128xf32>
    %99 = vector.broadcast %cst_53 : f32 to vector<2x128xf32>
    %100 = arith.select %97, %98, %99 : vector<2x128xi1>, vector<2x128xf32>
    %cst_54 = arith.constant dense<0.000000e+00> : vector<128xf32>
    %101 = vector.multi_reduction <add>, %100, %cst_54 [0] : vector<2x128xf32> to vector<128xf32>
    %102 = vector.shape_cast %101 : vector<128xf32> to vector<1x128xf32>
    %cst_55 = arith.constant 0.000000e+00 : f32
    %103 = vector.broadcast %cst_55 : f32 to vector<2x128xf32>
    %104 = arith.select %97, %22, %103 : vector<2x128xi1>, vector<2x128xf32>
    %cst_56 = arith.constant dense<0.000000e+00> : vector<128xf32>
    %105 = vector.multi_reduction <add>, %104, %cst_56 [0] : vector<2x128xf32> to vector<128xf32>
    %106 = vector.shape_cast %105 : vector<128xf32> to vector<1x128xf32>
    %cst_57 = arith.constant 5.000000e-01 : f32
    %107 = vector.broadcast %cst_57 : f32 to vector<2x128xf32>
    %108 = arith.cmpf ogt, %22, %107 : vector<2x128xf32>
    %cst_58 = arith.constant 1.000000e+00 : f32
    %cst_59 = arith.constant 0.000000e+00 : f32
    %109 = vector.broadcast %cst_58 : f32 to vector<2x128xf32>
    %110 = vector.broadcast %cst_59 : f32 to vector<2x128xf32>
    %111 = arith.select %108, %109, %110 : vector<2x128xi1>, vector<2x128xf32>
    %cst_60 = arith.constant dense<0.000000e+00> : vector<128xf32>
    %112 = vector.multi_reduction <add>, %111, %cst_60 [0] : vector<2x128xf32> to vector<128xf32>
    %113 = vector.shape_cast %112 : vector<128xf32> to vector<1x128xf32>
    %cst_61 = arith.constant 0.000000e+00 : f32
    %114 = vector.broadcast %cst_61 : f32 to vector<2x128xf32>
    %115 = arith.select %108, %22, %114 : vector<2x128xi1>, vector<2x128xf32>
    %cst_62 = arith.constant dense<0.000000e+00> : vector<128xf32>
    %116 = vector.multi_reduction <add>, %115, %cst_62 [0] : vector<2x128xf32> to vector<128xf32>
    %117 = vector.shape_cast %116 : vector<128xf32> to vector<1x128xf32>
    %cst_63 = arith.constant 2.500000e-01 : f32
    %118 = vector.broadcast %cst_63 : f32 to vector<2x128xf32>
    %119 = arith.cmpf ogt, %22, %118 : vector<2x128xf32>
    %cst_64 = arith.constant 1.000000e+00 : f32
    %cst_65 = arith.constant 0.000000e+00 : f32
    %120 = vector.broadcast %cst_64 : f32 to vector<2x128xf32>
    %121 = vector.broadcast %cst_65 : f32 to vector<2x128xf32>
    %122 = arith.select %119, %120, %121 : vector<2x128xi1>, vector<2x128xf32>
    %cst_66 = arith.constant dense<0.000000e+00> : vector<128xf32>
    %123 = vector.multi_reduction <add>, %122, %cst_66 [0] : vector<2x128xf32> to vector<128xf32>
    %124 = vector.shape_cast %123 : vector<128xf32> to vector<1x128xf32>
    %cst_67 = arith.constant 0.000000e+00 : f32
    %125 = vector.broadcast %cst_67 : f32 to vector<2x128xf32>
    %126 = arith.select %119, %22, %125 : vector<2x128xi1>, vector<2x128xf32>
    %cst_68 = arith.constant dense<0.000000e+00> : vector<128xf32>
    %127 = vector.multi_reduction <add>, %126, %cst_68 [0] : vector<2x128xf32> to vector<128xf32>
    %128 = vector.shape_cast %127 : vector<128xf32> to vector<1x128xf32>
    %cst_69 = arith.constant 1.250000e-01 : f32
    %129 = vector.broadcast %cst_69 : f32 to vector<2x128xf32>
    %130 = arith.cmpf ogt, %22, %129 : vector<2x128xf32>
    %cst_70 = arith.constant 1.000000e+00 : f32
    %cst_71 = arith.constant 0.000000e+00 : f32
    %131 = vector.broadcast %cst_70 : f32 to vector<2x128xf32>
    %132 = vector.broadcast %cst_71 : f32 to vector<2x128xf32>
    %133 = arith.select %130, %131, %132 : vector<2x128xi1>, vector<2x128xf32>
    %cst_72 = arith.constant dense<0.000000e+00> : vector<128xf32>
    %134 = vector.multi_reduction <add>, %133, %cst_72 [0] : vector<2x128xf32> to vector<128xf32>
    %135 = vector.shape_cast %134 : vector<128xf32> to vector<1x128xf32>
    %cst_73 = arith.constant 0.000000e+00 : f32
    %136 = vector.broadcast %cst_73 : f32 to vector<2x128xf32>
    %137 = arith.select %130, %22, %136 : vector<2x128xi1>, vector<2x128xf32>
    %cst_74 = arith.constant dense<0.000000e+00> : vector<128xf32>
    %138 = vector.multi_reduction <add>, %137, %cst_74 [0] : vector<2x128xf32> to vector<128xf32>
    %139 = vector.shape_cast %138 : vector<128xf32> to vector<1x128xf32>
    %cst_75 = arith.constant 6.250000e-02 : f32
    %140 = vector.broadcast %cst_75 : f32 to vector<2x128xf32>
    %141 = arith.cmpf ogt, %22, %140 : vector<2x128xf32>
    %cst_76 = arith.constant 1.000000e+00 : f32
    %cst_77 = arith.constant 0.000000e+00 : f32
    %142 = vector.broadcast %cst_76 : f32 to vector<2x128xf32>
    %143 = vector.broadcast %cst_77 : f32 to vector<2x128xf32>
    %144 = arith.select %141, %142, %143 : vector<2x128xi1>, vector<2x128xf32>
    %cst_78 = arith.constant dense<0.000000e+00> : vector<128xf32>
    %145 = vector.multi_reduction <add>, %144, %cst_78 [0] : vector<2x128xf32> to vector<128xf32>
    %146 = vector.shape_cast %145 : vector<128xf32> to vector<1x128xf32>
    %cst_79 = arith.constant 0.000000e+00 : f32
    %147 = vector.broadcast %cst_79 : f32 to vector<2x128xf32>
    %148 = arith.select %141, %22, %147 : vector<2x128xi1>, vector<2x128xf32>
    %cst_80 = arith.constant dense<0.000000e+00> : vector<128xf32>
    %149 = vector.multi_reduction <add>, %148, %cst_80 [0] : vector<2x128xf32> to vector<128xf32>
    %150 = vector.shape_cast %149 : vector<128xf32> to vector<1x128xf32>
    %cst_81 = arith.constant 3.125000e-02 : f32
    %151 = vector.broadcast %cst_81 : f32 to vector<2x128xf32>
    %152 = arith.cmpf ogt, %22, %151 : vector<2x128xf32>
    %cst_82 = arith.constant 1.000000e+00 : f32
    %cst_83 = arith.constant 0.000000e+00 : f32
    %153 = vector.broadcast %cst_82 : f32 to vector<2x128xf32>
    %154 = vector.broadcast %cst_83 : f32 to vector<2x128xf32>
    %155 = arith.select %152, %153, %154 : vector<2x128xi1>, vector<2x128xf32>
    %cst_84 = arith.constant dense<0.000000e+00> : vector<128xf32>
    %156 = vector.multi_reduction <add>, %155, %cst_84 [0] : vector<2x128xf32> to vector<128xf32>
    %157 = vector.shape_cast %156 : vector<128xf32> to vector<1x128xf32>
    %cst_85 = arith.constant 0.000000e+00 : f32
    %158 = vector.broadcast %cst_85 : f32 to vector<2x128xf32>
    %159 = arith.select %152, %22, %158 : vector<2x128xi1>, vector<2x128xf32>
    %cst_86 = arith.constant dense<0.000000e+00> : vector<128xf32>
    %160 = vector.multi_reduction <add>, %159, %cst_86 [0] : vector<2x128xf32> to vector<128xf32>
    %161 = vector.shape_cast %160 : vector<128xf32> to vector<1x128xf32>
    %cst_87 = arith.constant 1.562500e-02 : f32
    %162 = vector.broadcast %cst_87 : f32 to vector<2x128xf32>
    %163 = arith.cmpf ogt, %22, %162 : vector<2x128xf32>
    %cst_88 = arith.constant 1.000000e+00 : f32
    %cst_89 = arith.constant 0.000000e+00 : f32
    %164 = vector.broadcast %cst_88 : f32 to vector<2x128xf32>
    %165 = vector.broadcast %cst_89 : f32 to vector<2x128xf32>
    %166 = arith.select %163, %164, %165 : vector<2x128xi1>, vector<2x128xf32>
    %cst_90 = arith.constant dense<0.000000e+00> : vector<128xf32>
    %167 = vector.multi_reduction <add>, %166, %cst_90 [0] : vector<2x128xf32> to vector<128xf32>
    %168 = vector.shape_cast %167 : vector<128xf32> to vector<1x128xf32>
    %cst_91 = arith.constant 0.000000e+00 : f32
    %169 = vector.broadcast %cst_91 : f32 to vector<2x128xf32>
    %170 = arith.select %163, %22, %169 : vector<2x128xi1>, vector<2x128xf32>
    %cst_92 = arith.constant dense<0.000000e+00> : vector<128xf32>
    %171 = vector.multi_reduction <add>, %170, %cst_92 [0] : vector<2x128xf32> to vector<128xf32>
    %172 = vector.shape_cast %171 : vector<128xf32> to vector<1x128xf32>
    %cst_93 = arith.constant 7.812500e-03 : f32
    %173 = vector.broadcast %cst_93 : f32 to vector<2x128xf32>
    %174 = arith.cmpf ogt, %22, %173 : vector<2x128xf32>
    %cst_94 = arith.constant 1.000000e+00 : f32
    %cst_95 = arith.constant 0.000000e+00 : f32
    %175 = vector.broadcast %cst_94 : f32 to vector<2x128xf32>
    %176 = vector.broadcast %cst_95 : f32 to vector<2x128xf32>
    %177 = arith.select %174, %175, %176 : vector<2x128xi1>, vector<2x128xf32>
    %cst_96 = arith.constant dense<0.000000e+00> : vector<128xf32>
    %178 = vector.multi_reduction <add>, %177, %cst_96 [0] : vector<2x128xf32> to vector<128xf32>
    %179 = vector.shape_cast %178 : vector<128xf32> to vector<1x128xf32>
    %cst_97 = arith.constant 0.000000e+00 : f32
    %180 = vector.broadcast %cst_97 : f32 to vector<2x128xf32>
    %181 = arith.select %174, %22, %180 : vector<2x128xi1>, vector<2x128xf32>
    %cst_98 = arith.constant dense<0.000000e+00> : vector<128xf32>
    %182 = vector.multi_reduction <add>, %181, %cst_98 [0] : vector<2x128xf32> to vector<128xf32>
    %183 = vector.shape_cast %182 : vector<128xf32> to vector<1x128xf32>
    %cst_99 = arith.constant 3.906250e-03 : f32
    %184 = vector.broadcast %cst_99 : f32 to vector<2x128xf32>
    %185 = arith.cmpf ogt, %22, %184 : vector<2x128xf32>
    %cst_100 = arith.constant 1.000000e+00 : f32
    %cst_101 = arith.constant 0.000000e+00 : f32
    %186 = vector.broadcast %cst_100 : f32 to vector<2x128xf32>
    %187 = vector.broadcast %cst_101 : f32 to vector<2x128xf32>
    %188 = arith.select %185, %186, %187 : vector<2x128xi1>, vector<2x128xf32>
    %cst_102 = arith.constant dense<0.000000e+00> : vector<128xf32>
    %189 = vector.multi_reduction <add>, %188, %cst_102 [0] : vector<2x128xf32> to vector<128xf32>
    %190 = vector.shape_cast %189 : vector<128xf32> to vector<1x128xf32>
    %cst_103 = arith.constant 0.000000e+00 : f32
    %191 = vector.broadcast %cst_103 : f32 to vector<2x128xf32>
    %192 = arith.select %185, %22, %191 : vector<2x128xi1>, vector<2x128xf32>
    %cst_104 = arith.constant dense<0.000000e+00> : vector<128xf32>
    %193 = vector.multi_reduction <add>, %192, %cst_104 [0] : vector<2x128xf32> to vector<128xf32>
    %194 = vector.shape_cast %193 : vector<128xf32> to vector<1x128xf32>
    %cst_105 = arith.constant 0.000000e+00 : f32
    %195 = vector.broadcast %cst_105 : f32 to vector<2x128xf32>
    %196 = arith.cmpf ogt, %22, %195 : vector<2x128xf32>
    %cst_106 = arith.constant 1.000000e+00 : f32
    %cst_107 = arith.constant 0.000000e+00 : f32
    %197 = vector.broadcast %cst_106 : f32 to vector<2x128xf32>
    %198 = vector.broadcast %cst_107 : f32 to vector<2x128xf32>
    %199 = arith.select %196, %197, %198 : vector<2x128xi1>, vector<2x128xf32>
    %cst_108 = arith.constant dense<0.000000e+00> : vector<128xf32>
    %200 = vector.multi_reduction <add>, %199, %cst_108 [0] : vector<2x128xf32> to vector<128xf32>
    %201 = vector.shape_cast %200 : vector<128xf32> to vector<1x128xf32>
    %cst_109 = arith.constant 0.000000e+00 : f32
    %202 = vector.broadcast %cst_109 : f32 to vector<2x128xf32>
    %203 = arith.select %196, %22, %202 : vector<2x128xi1>, vector<2x128xf32>
    %cst_110 = arith.constant dense<0.000000e+00> : vector<128xf32>
    %204 = vector.multi_reduction <add>, %203, %cst_110 [0] : vector<2x128xf32> to vector<128xf32>
    %205 = vector.shape_cast %204 : vector<128xf32> to vector<1x128xf32>
    %c0_111 = arith.constant 0 : index
    %c0_112 = arith.constant 0 : index
    %c0_113 = arith.constant 0 : index
    %206 = vector.load %arg4[%c0_111, %c0_112, %c0_113] : memref<1x2x128xf32, #tpu.memory_space<vmem>>, vector<1x2x128xf32>
    %207 = vector.shape_cast %206 : vector<1x2x128xf32> to vector<2x128xf32>
    %c0_114 = arith.constant 0 : index
    %c1 = arith.constant 1 : index
    %c0_115 = arith.constant 0 : index
    %c0_116 = arith.constant 0 : index
    %208 = vector.load %arg2[%c0_114, %c1, %c0_115, %c0_116] : memref<1x6x2x128xf32, #tpu.memory_space<vmem>>, vector<1x1x2x128xf32>
    %209 = vector.shape_cast %208 : vector<1x1x2x128xf32> to vector<2x128xf32>
    %210 = math.absf %209 : vector<2x128xf32>
    %cst_117 = arith.constant 0.000000e+00 : f32
    %211 = vector.broadcast %cst_117 : f32 to vector<2x128xf32>
    %212 = arith.subf %211, %210 : vector<2x128xf32>
    %213 = math.exp %212 : vector<2x128xf32>
    %cst_118 = arith.constant 1.000000e+00 : f32
    %214 = vector.broadcast %cst_118 : f32 to vector<2x128xf32>
    %215 = arith.addf %214, %213 : vector<2x128xf32>
    %216 = math.log %215 : vector<2x128xf32>
    %cst_119 = arith.constant 0.000000e+00 : f32
    %217 = vector.broadcast %cst_119 : f32 to vector<2x128xf32>
    %218 = arith.maximumf %209, %217 : vector<2x128xf32>
    %219 = arith.mulf %209, %207 : vector<2x128xf32>
    %220 = arith.subf %218, %219 : vector<2x128xf32>
    %221 = arith.addf %220, %216 : vector<2x128xf32>
    %cst_120 = arith.constant 1.000000e+02 : f32
    %222 = vector.broadcast %cst_120 : f32 to vector<2x128xf32>
    %223 = arith.minimumf %221, %222 : vector<2x128xf32>
    %224 = arith.mulf %223, %4 : vector<2x128xf32>
    %cst_121 = arith.constant dense<0.000000e+00> : vector<128xf32>
    %225 = vector.multi_reduction <add>, %224, %cst_121 [0] : vector<2x128xf32> to vector<128xf32>
    %226 = vector.shape_cast %225 : vector<128xf32> to vector<1x128xf32>
    %227 = arith.mulf %223, %5 : vector<2x128xf32>
    %cst_122 = arith.constant dense<0.000000e+00> : vector<128xf32>
    %228 = vector.multi_reduction <add>, %227, %cst_122 [0] : vector<2x128xf32> to vector<128xf32>
    %229 = vector.shape_cast %228 : vector<128xf32> to vector<1x128xf32>
    %230 = arith.mulf %207, %3 : vector<2x128xf32>
    %cst_123 = arith.constant dense<0.000000e+00> : vector<128xf32>
    %231 = vector.multi_reduction <add>, %230, %cst_123 [0] : vector<2x128xf32> to vector<128xf32>
    %232 = vector.shape_cast %231 : vector<128xf32> to vector<1x128xf32>
    %c0_124 = arith.constant 0 : index
    %c0_125 = arith.constant 0 : index
    %c0_126 = arith.constant 0 : index
    %233 = vector.load %arg6[%c0_124, %c0_125, %c0_126] : memref<1x2x128xf32, #tpu.memory_space<vmem>>, vector<1x2x128xf32>
    %234 = vector.shape_cast %233 : vector<1x2x128xf32> to vector<2x128xf32>
    %c0_127 = arith.constant 0 : index
    %c0_128 = arith.constant 0 : index
    %c0_129 = arith.constant 0 : index
    %235 = vector.load %arg7[%c0_127, %c0_128, %c0_129] : memref<1x2x128xf32, #tpu.memory_space<vmem>>, vector<1x2x128xf32>
    %236 = vector.shape_cast %235 : vector<1x2x128xf32> to vector<2x128xf32>
    %c0_130 = arith.constant 0 : index
    %c4 = arith.constant 4 : index
    %c0_131 = arith.constant 0 : index
    %c0_132 = arith.constant 0 : index
    %237 = vector.load %arg2[%c0_130, %c4, %c0_131, %c0_132] : memref<1x6x2x128xf32, #tpu.memory_space<vmem>>, vector<1x1x2x128xf32>
    %238 = vector.shape_cast %237 : vector<1x1x2x128xf32> to vector<2x128xf32>
    %c0_133 = arith.constant 0 : index
    %c5 = arith.constant 5 : index
    %c0_134 = arith.constant 0 : index
    %c0_135 = arith.constant 0 : index
    %239 = vector.load %arg2[%c0_133, %c5, %c0_134, %c0_135] : memref<1x6x2x128xf32, #tpu.memory_space<vmem>>, vector<1x1x2x128xf32>
    %240 = vector.shape_cast %239 : vector<1x1x2x128xf32> to vector<2x128xf32>
    %cst_136 = arith.constant 0.00999999977 : f32
    %241 = vector.broadcast %cst_136 : f32 to vector<2x128xf32>
    %242 = arith.addf %234, %241 : vector<2x128xf32>
    %243 = tpu.reciprocal %242 {approx = true} : vector<2x128xf32> -> vector<2x128xf32>
    %244 = arith.mulf %238, %243 : vector<2x128xf32>
    %cst_137 = arith.constant 1.000000e+00 : f32
    %245 = vector.broadcast %cst_137 : f32 to vector<2x128xf32>
    %246 = arith.subf %244, %245 : vector<2x128xf32>
    %247 = math.absf %246 : vector<2x128xf32>
    %cst_138 = arith.constant 1.000000e+00 : f32
    %248 = vector.broadcast %cst_138 : f32 to vector<2x128xf32>
    %249 = arith.cmpf olt, %247, %248 : vector<2x128xf32>
    %cst_139 = arith.constant 5.000000e-01 : f32
    %250 = vector.broadcast %cst_139 : f32 to vector<2x128xf32>
    %251 = arith.mulf %250, %247 : vector<2x128xf32>
    %252 = arith.mulf %251, %247 : vector<2x128xf32>
    %cst_140 = arith.constant 5.000000e-01 : f32
    %253 = vector.broadcast %cst_140 : f32 to vector<2x128xf32>
    %254 = arith.subf %247, %253 : vector<2x128xf32>
    %255 = arith.select %249, %252, %254 : vector<2x128xi1>, vector<2x128xf32>
    %cst_141 = arith.constant 0.00999999977 : f32
    %256 = vector.broadcast %cst_141 : f32 to vector<2x128xf32>
    %257 = arith.addf %236, %256 : vector<2x128xf32>
    %258 = tpu.reciprocal %257 {approx = true} : vector<2x128xf32> -> vector<2x128xf32>
    %259 = arith.mulf %240, %258 : vector<2x128xf32>
    %cst_142 = arith.constant 1.000000e+00 : f32
    %260 = vector.broadcast %cst_142 : f32 to vector<2x128xf32>
    %261 = arith.subf %259, %260 : vector<2x128xf32>
    %262 = math.absf %261 : vector<2x128xf32>
    %cst_143 = arith.constant 1.000000e+00 : f32
    %263 = vector.broadcast %cst_143 : f32 to vector<2x128xf32>
    %264 = arith.cmpf olt, %262, %263 : vector<2x128xf32>
    %cst_144 = arith.constant 5.000000e-01 : f32
    %265 = vector.broadcast %cst_144 : f32 to vector<2x128xf32>
    %266 = arith.mulf %265, %262 : vector<2x128xf32>
    %267 = arith.mulf %266, %262 : vector<2x128xf32>
    %cst_145 = arith.constant 5.000000e-01 : f32
    %268 = vector.broadcast %cst_145 : f32 to vector<2x128xf32>
    %269 = arith.subf %262, %268 : vector<2x128xf32>
    %270 = arith.select %264, %267, %269 : vector<2x128xi1>, vector<2x128xf32>
    %271 = arith.addf %234, %236 : vector<2x128xf32>
    %cst_146 = arith.constant 1.000000e+00 : f32
    %272 = vector.broadcast %cst_146 : f32 to vector<2x128xf32>
    %273 = arith.addf %271, %272 : vector<2x128xf32>
    %274 = math.log %273 : vector<2x128xf32>
    %275 = arith.addf %255, %270 : vector<2x128xf32>
    %276 = arith.mulf %274, %275 : vector<2x128xf32>
    %277 = arith.mulf %276, %230 : vector<2x128xf32>
    %cst_147 = arith.constant dense<0.000000e+00> : vector<128xf32>
    %278 = vector.multi_reduction <add>, %277, %cst_147 [0] : vector<2x128xf32> to vector<128xf32>
    %279 = vector.shape_cast %278 : vector<128xf32> to vector<1x128xf32>
    %c0_148 = arith.constant 0 : index
    %c2 = arith.constant 2 : index
    %c0_149 = arith.constant 0 : index
    %c0_150 = arith.constant 0 : index
    %280 = vector.load %arg2[%c0_148, %c2, %c0_149, %c0_150] : memref<1x6x2x128xf32, #tpu.memory_space<vmem>>, vector<1x1x2x128xf32>
    %281 = vector.shape_cast %280 : vector<1x1x2x128xf32> to vector<2x128xf32>
    %c0_151 = arith.constant 0 : index
    %c3 = arith.constant 3 : index
    %c0_152 = arith.constant 0 : index
    %c0_153 = arith.constant 0 : index
    %282 = vector.load %arg2[%c0_151, %c3, %c0_152, %c0_153] : memref<1x6x2x128xf32, #tpu.memory_space<vmem>>, vector<1x1x2x128xf32>
    %283 = vector.shape_cast %282 : vector<1x1x2x128xf32> to vector<2x128xf32>
    %284 = arith.mulf %281, %281 : vector<2x128xf32>
    %285 = arith.mulf %283, %283 : vector<2x128xf32>
    %286 = arith.addf %284, %285 : vector<2x128xf32>
    %cst_154 = arith.constant 9.99999993E-9 : f32
    %287 = vector.broadcast %cst_154 : f32 to vector<2x128xf32>
    %288 = arith.addf %286, %287 : vector<2x128xf32>
    %289 = math.rsqrt %288 : vector<2x128xf32>
    %290 = arith.mulf %281, %289 : vector<2x128xf32>
    %c0_155 = arith.constant 0 : index
    %c0_156 = arith.constant 0 : index
    %c0_157 = arith.constant 0 : index
    %291 = vector.load %arg8[%c0_155, %c0_156, %c0_157] : memref<1x2x128xf32, #tpu.memory_space<vmem>>, vector<1x2x128xf32>
    %292 = vector.shape_cast %291 : vector<1x2x128xf32> to vector<2x128xf32>
    %293 = arith.subf %290, %292 : vector<2x128xf32>
    %294 = math.absf %293 : vector<2x128xf32>
    %cst_158 = arith.constant 1.000000e+00 : f32
    %295 = vector.broadcast %cst_158 : f32 to vector<2x128xf32>
    %296 = arith.cmpf olt, %294, %295 : vector<2x128xf32>
    %cst_159 = arith.constant 5.000000e-01 : f32
    %297 = vector.broadcast %cst_159 : f32 to vector<2x128xf32>
    %298 = arith.mulf %297, %294 : vector<2x128xf32>
    %299 = arith.mulf %298, %294 : vector<2x128xf32>
    %cst_160 = arith.constant 5.000000e-01 : f32
    %300 = vector.broadcast %cst_160 : f32 to vector<2x128xf32>
    %301 = arith.subf %294, %300 : vector<2x128xf32>
    %302 = arith.select %296, %299, %301 : vector<2x128xi1>, vector<2x128xf32>
    %303 = arith.mulf %302, %230 : vector<2x128xf32>
    %cst_161 = arith.constant dense<0.000000e+00> : vector<128xf32>
    %304 = vector.multi_reduction <add>, %303, %cst_161 [0] : vector<2x128xf32> to vector<128xf32>
    %305 = vector.shape_cast %304 : vector<128xf32> to vector<1x128xf32>
    %306 = arith.mulf %283, %289 : vector<2x128xf32>
    %c0_162 = arith.constant 0 : index
    %c0_163 = arith.constant 0 : index
    %c0_164 = arith.constant 0 : index
    %307 = vector.load %arg9[%c0_162, %c0_163, %c0_164] : memref<1x2x128xf32, #tpu.memory_space<vmem>>, vector<1x2x128xf32>
    %308 = vector.shape_cast %307 : vector<1x2x128xf32> to vector<2x128xf32>
    %309 = arith.subf %306, %308 : vector<2x128xf32>
    %310 = math.absf %309 : vector<2x128xf32>
    %cst_165 = arith.constant 1.000000e+00 : f32
    %311 = vector.broadcast %cst_165 : f32 to vector<2x128xf32>
    %312 = arith.cmpf olt, %310, %311 : vector<2x128xf32>
    %cst_166 = arith.constant 5.000000e-01 : f32
    %313 = vector.broadcast %cst_166 : f32 to vector<2x128xf32>
    %314 = arith.mulf %313, %310 : vector<2x128xf32>
    %315 = arith.mulf %314, %310 : vector<2x128xf32>
    %cst_167 = arith.constant 5.000000e-01 : f32
    %316 = vector.broadcast %cst_167 : f32 to vector<2x128xf32>
    %317 = arith.subf %310, %316 : vector<2x128xf32>
    %318 = arith.select %312, %315, %317 : vector<2x128xi1>, vector<2x128xf32>
    %319 = arith.mulf %318, %230 : vector<2x128xf32>
    %cst_168 = arith.constant dense<0.000000e+00> : vector<128xf32>
    %320 = vector.multi_reduction <add>, %319, %cst_168 [0] : vector<2x128xf32> to vector<128xf32>
    %321 = vector.shape_cast %320 : vector<128xf32> to vector<1x128xf32>
    %322 = tpu.concatenate %24, %26, %29, %226, %229, %232, %279, %305, %321, %36, %47, %58, %69, %80, %91, %102 in 0 : vector<1x128xf32>, vector<1x128xf32>, vector<1x128xf32>, vector<1x128xf32>, vector<1x128xf32>, vector<1x128xf32>, vector<1x128xf32>, vector<1x128xf32>, vector<1x128xf32>, vector<1x128xf32>, vector<1x128xf32>, vector<1x128xf32>, vector<1x128xf32>, vector<1x128xf32>, vector<1x128xf32>, vector<1x128xf32> -> vector<16x128xf32>
    %323 = tpu.concatenate %113, %124, %135, %146, %157, %168, %179, %190, %201, %40, %51, %62, %73, %84, %95, %106 in 0 : vector<1x128xf32>, vector<1x128xf32>, vector<1x128xf32>, vector<1x128xf32>, vector<1x128xf32>, vector<1x128xf32>, vector<1x128xf32>, vector<1x128xf32>, vector<1x128xf32>, vector<1x128xf32>, vector<1x128xf32>, vector<1x128xf32>, vector<1x128xf32>, vector<1x128xf32>, vector<1x128xf32>, vector<1x128xf32> -> vector<16x128xf32>
    %324 = tpu.concatenate %117, %128, %139, %150, %161, %172, %183, %194, %205 in 0 : vector<1x128xf32>, vector<1x128xf32>, vector<1x128xf32>, vector<1x128xf32>, vector<1x128xf32>, vector<1x128xf32>, vector<1x128xf32>, vector<1x128xf32>, vector<1x128xf32> -> vector<9x128xf32>
    %325 = tpu.concatenate %322, %323, %324 in 0 : vector<16x128xf32>, vector<16x128xf32>, vector<9x128xf32> -> vector<41x128xf32>
    %c0_169 = arith.constant 0 : index
    %c0_170 = arith.constant 0 : index
    %c0_171 = arith.constant 0 : index
    %c0_172 = arith.constant 0 : index
    %326 = vector.load %arg10[%c0_169, %c0_170, %c0_171, %c0_172] : memref<1x1x41x128xf32, #tpu.memory_space<vmem>>, vector<1x1x41x128xf32>
    %327 = vector.shape_cast %326 : vector<1x1x41x128xf32> to vector<41x128xf32>
    %328 = vector.shape_cast %325 : vector<41x128xf32> to vector<1x1x41x128xf32>
    tpu.vector_store %arg10[%c0_169, %c0_170, %c0_171, %c0_172], %328 {strides = array<i32>} : memref<1x1x41x128xf32, #tpu.memory_space<vmem>>, vector<1x1x41x128xf32>,
    return
  }
  func.func @transform_0(%arg0: i32, %arg1: i32) -> (i32, i32, i32, i32) {
    %c0_i32 = arith.constant 0 : i32
    %c0_i32_0 = arith.constant 0 : i32
    %c0_i32_1 = arith.constant 0 : i32
    return %arg0, %c0_i32, %arg1, %c0_i32_0 : i32, i32, i32, i32
  }
  func.func @transform_1(%arg0: i32, %arg1: i32) -> (i32, i32, i32) {
    %c0_i32 = arith.constant 0 : i32
    %c0_i32_0 = arith.constant 0 : i32
    return %arg0, %arg1, %c0_i32 : i32, i32, i32
  }
  func.func @transform_2(%arg0: i32, %arg1: i32) -> (i32, i32, i32) {
    %c0_i32 = arith.constant 0 : i32
    %c0_i32_0 = arith.constant 0 : i32
    return %arg0, %arg1, %c0_i32 : i32, i32, i32
  }
  func.func @transform_3(%arg0: i32, %arg1: i32) -> (i32, i32, i32) {
    %c0_i32 = arith.constant 0 : i32
    %c0_i32_0 = arith.constant 0 : i32
    return %arg0, %arg1, %c0_i32 : i32, i32, i32
  }
  func.func @transform_4(%arg0: i32, %arg1: i32) -> (i32, i32, i32) {
    %c0_i32 = arith.constant 0 : i32
    %c0_i32_0 = arith.constant 0 : i32
    return %arg0, %arg1, %c0_i32 : i32, i32, i32
  }
  func.func @transform_5(%arg0: i32, %arg1: i32) -> (i32, i32, i32) {
    %c0_i32 = arith.constant 0 : i32
    %c0_i32_0 = arith.constant 0 : i32
    return %arg0, %arg1, %c0_i32 : i32, i32, i32
  }
  func.func @transform_6(%arg0: i32, %arg1: i32) -> (i32, i32, i32) {
    %c0_i32 = arith.constant 0 : i32
    %c0_i32_0 = arith.constant 0 : i32
    return %arg0, %arg1, %c0_i32 : i32, i32, i32
  }
  func.func @transform_7(%arg0: i32, %arg1: i32) -> (i32, i32, i32) {
    %c0_i32 = arith.constant 0 : i32
    %c0_i32_0 = arith.constant 0 : i32
    return %arg0, %arg1, %c0_i32 : i32, i32, i32
  }
  func.func @transform_8(%arg0: i32, %arg1: i32) -> (i32, i32, i32, i32) {
    %c0_i32 = arith.constant 0 : i32
    %c0_i32_0 = arith.constant 0 : i32
    %c0_i32_1 = arith.constant 0 : i32
    return %arg0, %arg1, %c0_i32, %c0_i32_0 : i32, i32, i32, i32
  }
}

</mosaic_0001>

<bundles_post_ra>
// kernel: eq.2
= control target key start
LH: loop header
LB: loop body
LE: loop exit
PB: predicated region body
PF: predicated region fallthrough
CT: control target
= control target key end

     0   :  { %vm7_vm0 = vcmask 31744   ;;  %vm13_vm1 = vcmask 64544   ;;  %s39_s0 = inlined_call_operand.vmem [shape: s32[2,4], index: 0, kind: input, shape index: {}]   ;;  %s40_s1 = inlined_call_operand.vmem [shape: s32[8], index: 1, kind: output, shape index: {}]  }
   0x1   :  { %v4_v0 = vld [vmem:[%s39_s0] sm:$0x3]  ;;  %s22_s0 = smov 4  }
   0x2   :  { %5 = vst [vmem:[#allocation1] sm:$0x3] %v4_v0 }
   0x9   :  { %v10_v1 = vld [vmem:[#allocation1 + $0x1] sm:$0x1]   ;;  %v6_v2 = vld [vmem:[#allocation1] sm:$0x1]  }
   0xa   :  { %11 = vrot.lane.b32.xlu0 %v10_v1, %s22_s0  ;;  %8 = vst.msk [vmem:[#allocation0] sm:$0x1] %vm7_vm0, %v6_v2  }
  0x7c   :  { %v12_v3 = vpop.permute.xlu0 %11  }
  0x7d   :  { %14 = vst.msk [vmem:[#allocation0] sm:$0x1] %vm13_vm1, %v12_v3  }
  0x84   :  { %v18_v4 = vld [vmem:[#allocation0] sm:$0x1] }
  0x85   :  { %20 = vst [vmem:[%s40_s1] sm:$0x1] %v18_v4 }

// kernel: _forward_impl.1
= control target key start
LH: loop header
LB: loop body
LE: loop exit
PB: predicated region body
PF: predicated region fallthrough
CT: control target
= control target key end

     0   :  { %s1351_s27 = smov 0   ;;  %s1353_s28 = smov 0   ;;  %s1752_s0 = inlined_call_operand.vmem [shape: f32[2,6,2,128], index: 0, kind: input, shape index: {}]   ;;  %s1753_s1 = inlined_call_operand.vmem [shape: f32[2,2,128], index: 1, kind: input, shape index: {}]   ;;  %s1754_s2 = inlined_call_operand.vmem [shape: f32[2,2,128], index: 2, kind: input, shape index: {}]   ;;  %s1755_s3 = inlined_call_operand.vmem [shape: f32[2,2,128], index: 3, kind: input, shape index: {}]   ;;  %s1756_s4 = inlined_call_operand.vmem [shape: f32[2,2,128], index: 4, kind: input, shape index: {}]   ;;  %s1757_s5 = inlined_call_operand.vmem [shape: f32[2,2,128], index: 5, kind: input, shape index: {}]   ;;  %s1758_s6 = inlined_call_operand.vmem [shape: f32[2,2,128], index: 6, kind: input, shape index: {}]   ;;  %s1759_s7 = inlined_call_operand.vmem [shape: f32[2,2,128], index: 7, kind: input, shape index: {}]   ;;  %s1760_s8 = inlined_call_operand.vmem [shape: f32[2,1,41,128], index: 8, kind: output, shape index: {}]  }
   0x1   :  { %s1355_s29 = smov 0  }
   0x2 LB: > { %s30_s30 = sadd.s32 1, %s1299_s28  ;;  %p1215_p0 = scmp.ge.s32.totalorder %s1303_s29, 1  ;;  %s1303_s29 = sphi %s1355_s29, %s18_s29   ;;  %s1299_s28 = sphi %s1353_s28, %s1762_s28   ;;  %s1295_s27 = sphi %s1351_s27, %s1761_s27  }
   0x3   : > { %p32_p1 = scmp.ge.s32.totalorder %s30_s30, 2  ;;  %p379_p2 = scmp.lt.s32.totalorder %s1303_s29, 3 }
   0x5   : > { %s1764_s30 = smov (%p32_p1, %s30_s30), 0  ;;  %p380_p3 = pnand %p1215_p0, %p379_p2 }
   0x6   : > { %p469_p4 = scmp.lt.s32.totalorder (!%p380_p3), %s1295_s27, 1  ;;  %vm553_vm0 = vcmask (!%p380_p3), 1041408   ;;  %vm970_vm8 = vcmask (!%p380_p3), 1040384  }
   0x7   : > { %383 = sbr.rel (%p380_p3) target bundleno = 151 (0x97), region = 52 }
   0xe   : > { %s1766_s27 = smov (!%p469_p4, %s1295_s27), 1 }
   0xf   : > { %s1238_s9 = smul.u32 12, %s1766_s27  ;;  %s1373_s10 = sshll.u32 %s1766_s27, 1 }
  0x10   : > { %s504_s16 = scalar_lea.vmem %s1756_s4, %s1373_s10  ;;  %s511_s19 = scalar_lea.vmem %s1757_s5, %s1373_s10 }
  0x11   : > { %s1378_s13 = scalar_lea.vmem %s1752_s0, %s1238_s9  ;;  %s497_s22 = scalar_lea.vmem %s1755_s3, %s1373_s10  ;;  %v887_v4 = vld [vmem:[%s504_s16] sm:$0x3] }
  0x12   : > { %v1389_v0 = vld [vmem:[%s1378_s13] sm:$0x3]  ;;  %v1392_v1 = vld [vmem:[%s1378_s13 + $0x2] sm:$0x3]  ;;  %s483_s25 = scalar_lea.vmem %s1753_s1, %s1373_s10  ;;  %v1232_v8 = vld [vmem:[%s1378_s13 + $0x4] sm:$0x3]  ;;  %s490_s11 = scalar_lea.vmem %s1754_s2, %s1373_s10 }
  0x13   : > { %v540_v2 = vand.u32 2147483647, %v1389_v0  ;;  %v851_v3 = vand.u32 2147483647, %v1392_v1  ;;  %v888_v6 = vld [vmem:[%s511_s19] sm:$0x3]  ;;  %v931_v16 = vmul.f32 %v1232_v8, %v1232_v8  ;;  %s518_s15 = scalar_lea.vmem %s1758_s6, %s1373_s10  ;;  %s525_s18 = scalar_lea.vmem %s1759_s7, %s1373_s10 }
  0x14   : > { %v536_v9 = vld [vmem:[%s497_s22] sm:$0x3]  ;;  %v893_v11 = vadd.f32 0.01, %v887_v4  ;;  %v903_v13 = vadd.f32 0.01, %v888_v6  ;;  %v913_v19 = vadd.f32 %v888_v6, %v887_v4 }
  0x15   : > { %v541_v5 = vsub.f32 0.0, %v540_v2  ;;  %v852_v7 = vsub.f32 0.0, %v851_v3  ;;  %v535_v14 = vld [vmem:[%s483_s25] sm:$0x3]  ;;  %v1233_v15 = vld [vmem:[%s1378_s13 + $0x6] sm:$0x3] }
  0x16   : > { %v1406_v17 = vmul.f32 %v536_v9, %v535_v14  ;;  %v932_v18 = vmul.f32 %v1233_v15, %v1233_v15  ;;  %v848_v23 = vld [vmem:[%s490_s11] sm:$0x3]  ;;  %v914_v26 = vadd.f32 1.0, %v913_v19  ;;  %v1226_v32 = vld [vmem:[%s1378_s13 + $0x8] sm:$0x3]  ;;  %v547_v47 = vmax.f32 %v1389_v0, 0.0 }
  0x17   : > { %v542_v10 = vmul.f32 1.442695, %v541_v5  ;;  %v853_v12 = vmul.f32 1.442695, %v852_v7  ;;  %v1417_v25 = vmul.f32 %v848_v23, %v536_v9  ;;  %v1227_v37 = vld [vmem:[%s1378_s13 + $0xa] sm:$0x3]  ;;  %v548_v50 = vmul.f32 %v1389_v0, %v535_v14 }
  0x18   : > { %v933_v20 = vadd.f32 %v932_v18, %v931_v16  ;;  %v554_v21 = vsel %vm553_vm0, %v1406_v17, 0.0  ;;  %v1415_v22 = vsub.f32 %v536_v9, %v1406_v17  ;;  %v858_v51 = vmax.f32 %v1392_v1, 0.0  ;;  %v937_v54 = vld [vmem:[%s518_s15] sm:$0x3]  ;;  %s1239_s10 = smul.u32 48, %s1766_s27 }
  0x19   : > { %1265 = vpow2.f32 %v542_v10  ;;  %v555_v27 = vrot.slane %v554_v21, 4  ;;  %v880_v29 = vsel %vm553_vm0, %v1417_v25, 0.0  ;;  %v859_v52 = vmul.f32 %v1392_v1, %v848_v23  ;;  %v954_v59 = vld [vmem:[%s525_s18] sm:$0x3] }
  0x1a   : > { %1267 = vpow2.f32 %v853_v12  ;;  %v934_v24 = vadd.f32 1e-08, %v933_v20  ;;  %v561_v28 = vsel %vm553_vm0, %v1415_v22, 0.0  ;;  %v881_v36 = vrot.slane %v880_v29, 4  ;;  %s1663_s19 = scalar_lea.vmem %s1760_s8, %s1239_s10 }
  0x1b   : > { %1269 = vrcp.f32 %v893_v11  ;;  %v562_v31 = vrot.slane %v561_v28, 4  ;;  %v556_v35 = vadd.f32 %v555_v27, %v554_v21  ;;  %v549_v5 = vsub.f32 %v547_v47, %v548_v50 }
  0x1c   : > { %1271 = vrcp.f32 %v903_v13  ;;  %v882_v45 = vadd.f32 %v881_v36, %v880_v29  ;;  %v860_v9 = vsub.f32 %v858_v51, %v859_v52  ;;  %v1305_v47 = vmov 0.0  }
  0x1d   : > { %1273 = vrsqrt.f32 %v934_v24  ;;  %v563_v42 = vadd.f32 %v562_v31, %v561_v28  ;;  %v557_v44 = vrot.slane %v556_v35, 2 }
  0x1e   : > { %1275 = vlog2.f32 %v914_v26  ;;  %v883_v61 = vrot.slane %v882_v45, 2 }
  0x1f   : > { %v564_v55 = vrot.slane %v563_v42, 2  ;;  %v558_v60 = vadd.f32 %v557_v44, %v556_v35 }
  0x20   : > { %v1437_v12 = vadd.f32 %v883_v61, %v882_v45 }
  0x21   : > { %v565_v7 = vadd.f32 %v564_v55, %v563_v42  ;;  %v559_v19 = vrot.slane %v558_v60, 1 }
  0x22   : > { %v885_v36 = vrot.slane %v1437_v12, 1 }
  0x23   : > { %v1266_v30 = vpop.eup %1265  ;;  %v566_v28 = vrot.slane %v565_v7, 1  ;;  %v560_v35 = vadd.f32 %v559_v19, %v558_v60 }
  0x24   : > { %v1268_v33 = vpop.eup %1267  ;;  %v544_v34 = vadd.f32 1.0, %v1266_v30 }
  0x25   : > { %v1270_v38 = vpop.eup %1269  ;;  %v855_v39 = vadd.f32 1.0, %v1268_v33 }
  0x26   : > { %v1272_v40 = vpop.eup %1271  ;;  %1277 = vlog2.f32 %v544_v34  ;;  %v895_v41 = vmul.f32 %v1270_v38, %v1226_v32  ;;  %v567_v38 = vadd.f32 %v566_v28, %v565_v7  ;;  %v1483_v28 = vadd.f32 %v885_v36, %v1437_v12 }
  0x27   : > { %1279 = vlog2.f32 %v855_v39  ;;  %v905_v43 = vmul.f32 %v1272_v40, %v1227_v37  ;;  %v1274_v49 = vpop.eup %1273 }
  0x28   : > { %v1228_v46 = vadd.f32 -1.0, %v895_v41  ;;  %v936_v57 = vmul.f32 %v1274_v49, %v1232_v8  ;;  %v953_v58 = vmul.f32 %v1274_v49, %v1233_v15  ;;  %v1276_v2 = vpop.eup %1275 }
  0x29   : > { %v1230_v48 = vadd.f32 -1.0, %v905_v43  ;;  %v916_v14 = vmul.f32 0.6931472, %v1276_v2 }
  0x2a   : > { %v897_v53 = vand.u32 2147483647, %v1228_v46  ;;  %v938_v0 = vsub.f32 %v936_v57, %v937_v54  ;;  %v955_v1 = vsub.f32 %v953_v58, %v954_v59 }
  0x2b   : > { %v907_v56 = vand.u32 2147483647, %v1230_v48 }
  0x2c   : > { %v899_v62 = vmul.f32 0.5, %v897_v53  ;;  %v1229_v63 = vadd.f32 -0.5, %v897_v53  ;;  %vm898_vm1 = vcmp.lt.f32.partialorder %v897_v53, 1.0  ;;  %v939_v11 = vand.u32 2147483647, %v938_v0 }
  0x2d   : > { %v909_v3 = vmul.f32 0.5, %v907_v56  ;;  %v1231_v4 = vadd.f32 -0.5, %v907_v56  ;;  %vm908_vm2 = vcmp.lt.f32.partialorder %v907_v56, 1.0  ;;  %v1439_v15 = vand.u32 2147483647, %v955_v1 }
  0x2e   : > { %v900_v6 = vmul.f32 %v899_v62, %v897_v53  ;;  %v941_v21 = vmul.f32 0.5, %v939_v11  ;;  %vm940_vm3 = vcmp.lt.f32.partialorder %v939_v11, 1.0  ;;  %v1234_v26 = vadd.f32 -0.5, %v939_v11 }
  0x2f   : > { %v910_v10 = vmul.f32 %v909_v3, %v907_v56  ;;  %v958_v32 = vmul.f32 0.5, %v1439_v15  ;;  %v1235_v40 = vadd.f32 -0.5, %v1439_v15  ;;  %vm957_vm7 = vcmp.lt.f32.partialorder %v1439_v15, 1.0 }
  0x30   : > { %v1278_v8 = vpop.eup %1277  ;;  %v902_v13 = vsel %vm898_vm1, %v900_v6, %v1229_v63  ;;  %v942_v29 = vmul.f32 %v941_v21, %v939_v11 }
  0x31   : > { %v1280_v16 = vpop.eup %1279  ;;  %v546_v18 = vmul.f32 0.6931472, %v1278_v8  ;;  %v912_v20 = vsel %vm908_vm2, %v910_v10, %v1231_v4  ;;  %v959_v44 = vmul.f32 %v958_v32, %v1439_v15 }
  0x32   : > { %v857_v23 = vmul.f32 0.6931472, %v1280_v16  ;;  %v917_v24 = vadd.f32 %v912_v20, %v902_v13  ;;  %v944_v34 = vsel %vm940_vm3, %v942_v29, %v1234_v26 }
  0x33   : > { %v550_v27 = vadd.f32 %v549_v5, %v546_v18  ;;  %v1453_v43 = vmul.f32 %v944_v34, %v1417_v25  ;;  %v1487_v29 = vsel %vm957_vm7, %v959_v44, %v1235_v40  ;;  %vm973_vm7 = vcmask 1042432  }
  0x34   : > { %v1441_v30 = vadd.f32 %v860_v9, %v857_v23  ;;  %v918_v31 = vmul.f32 %v917_v24, %v916_v14 }
  0x35   : > { %v551_v33 = vmin.f32 %v550_v27, 100.0  ;;  %v1508_v40 = vsel %vm553_vm0, %v1453_v43, 0.0 }
  0x36   : > { %v862_v41 = vmin.f32 %v1441_v30, 100.0  ;;  %v919_v42 = vmul.f32 %v918_v31, %v1417_v25  ;;  %v1490_v30 = vsel %vm970_vm8, %v560_v35, %v567_v38 }
  0x37   : > { %v1446_v37 = vmul.f32 %v551_v33, %v1415_v22  ;;  %v568_v39 = vmul.f32 %v551_v33, %v1406_v17 }
  0x38   : > { %v1499_v12 = vmul.f32 %v862_v41, %v1415_v22  ;;  %v1502_v15 = vsel %vm553_vm0, %v919_v42, 0.0 }
  0x39   : > { %v569_v45 = vsel %vm553_vm0, %v568_v39, 0.0  ;;  %vm576_vm4 = vcmp.gt.f32.partialorder %v1446_v37, 64.0  ;;  %vm593_vm5 = vcmp.gt.f32.partialorder %v1446_v37, 32.0  ;;  %vm610_vm6 = vcmp.gt.f32.partialorder %v1446_v37, 16.0 }
  0x3a   : > { %v570_v46 = vrot.slane %v569_v45, 4  ;;  %v577_v48 = vsel %vm576_vm4, 1.0, %v1305_v47  ;;  %v585_v49 = vsel %vm576_vm4, %v1446_v37, 0.0  ;;  %v594_v50 = vsel %vm593_vm5, 1.0, %v1305_v47 }
  0x3b   : > { %v578_v51 = vsel %vm553_vm0, %v577_v48, 0.0  ;;  %v586_v52 = vsel %vm553_vm0, %v585_v49, 0.0  ;;  %v595_v53 = vsel %vm553_vm0, %v594_v50, 0.0  ;;  %v602_v54 = vsel %vm593_vm5, %v1446_v37, 0.0 }
  0x3c   : > { %v571_v55 = vadd.f32 %v570_v46, %v569_v45  ;;  %v579_v56 = vrot.slane %v578_v51, 4  ;;  %v587_v57 = vrot.slane %v586_v52, 4  ;;  %v596_v58 = vrot.slane %v595_v53, 4 }
  0x3d   : > { %v603_v59 = vsel %vm553_vm0, %v602_v54, 0.0  ;;  %v611_v60 = vsel %vm610_vm6, 1.0, %v1305_v47  ;;  %v619_v61 = vsel %vm610_vm6, %v1446_v37, 0.0  ;;  %vm627_vm9 = vcmp.gt.f32.partialorder %v1446_v37, 8.0 }
  0x3e   : > { %v572_v62 = vrot.slane %v571_v55, 2  ;;  %v580_v63 = vadd.f32 %v579_v56, %v578_v51  ;;  %v588_v2 = vadd.f32 %v587_v57, %v586_v52  ;;  %v597_v3 = vadd.f32 %v596_v58, %v595_v53 }
  0x3f   : > { %v604_v4 = vrot.slane %v603_v59, 4  ;;  %v612_v0 = vsel %vm553_vm0, %v611_v60, 0.0  ;;  %v620_v5 = vsel %vm553_vm0, %v619_v61, 0.0  ;;  %v628_v6 = vsel %vm627_vm9, 1.0, %v1305_v47 }
  0x40   : > { %v573_v1 = vadd.f32 %v572_v62, %v571_v55  ;;  %v581_v7 = vrot.slane %v580_v63, 2  ;;  %v589_v9 = vrot.slane %v588_v2, 2  ;;  %v598_v10 = vrot.slane %v597_v3, 2 }
  0x41   : > { %v605_v11 = vadd.f32 %v604_v4, %v603_v59  ;;  %v613_v8 = vrot.slane %v612_v0, 4  ;;  %v621_v13 = vrot.slane %v620_v5, 4  ;;  %v629_v14 = vsel %vm553_vm0, %v628_v6, 0.0 }
  0x42   : > { %v574_v16 = vrot.slane %v573_v1, 1  ;;  %v582_v18 = vadd.f32 %v581_v7, %v580_v63  ;;  %v590_v19 = vadd.f32 %v589_v9, %v588_v2  ;;  %v599_v20 = vadd.f32 %v598_v10, %v597_v3 }
  0x43   : > { %v606_v21 = vrot.slane %v605_v11, 2  ;;  %v614_v23 = vadd.f32 %v613_v8, %v612_v0  ;;  %v622_v24 = vadd.f32 %v621_v13, %v620_v5  ;;  %v630_v26 = vrot.slane %v629_v14, 4 }
  0x44   : > { %v583_v27 = vrot.slane %v582_v18, 1  ;;  %v591_v31 = vrot.slane %v590_v19, 1  ;;  %v600_v32 = vrot.slane %v599_v20, 1  ;;  %v636_v39 = vsel %vm627_vm9, %v1446_v37, 0.0 }
  0x45   : > { %v607_v33 = vadd.f32 %v606_v21, %v605_v11  ;;  %v615_v34 = vrot.slane %v614_v23, 2  ;;  %v1496_v45 = vmul.f32 %v862_v41, %v1406_v17  ;;  %v1504_v36 = vadd.f32 %v574_v16, %v573_v1 }
  0x46   : > { %v623_v35 = vrot.slane %v622_v24, 2  ;;  %v631_v38 = vadd.f32 %v630_v26, %v629_v14  ;;  %v1510_v44 = vadd.f32 %v583_v27, %v582_v18  ;;  %v637_v46 = vsel %vm553_vm0, %v636_v39, 0.0 }
  0x47   : > { %vm644_vm10 = vcmp.gt.f32.partialorder %v1446_v37, 4.0  ;;  %vm661_vm11 = vcmp.gt.f32.partialorder %v1446_v37, 2.0  ;;  %v1515_v17 = vadd.f32 %v591_v31, %v590_v19  ;;  %v1517_v22 = vadd.f32 %v600_v32, %v599_v20 }
  0x48   : > { %v608_v41 = vrot.slane %v607_v33, 1  ;;  %v616_v42 = vadd.f32 %v615_v34, %v614_v23  ;;  %v638_v48 = vrot.slane %v637_v46, 4  ;;  %v645_v49 = vsel %vm644_vm10, 1.0, %v1305_v47 }
  0x49   : > { %v653_v43 = vsel %vm644_vm10, %v1446_v37, 0.0  ;;  %v662_v50 = vsel %vm661_vm11, 1.0, %v1305_v47  ;;  %v624_v51 = vadd.f32 %v623_v35, %v622_v24  ;;  %v632_v52 = vrot.slane %v631_v38, 2 }
  0x4a   : > { %v646_v53 = vsel %vm553_vm0, %v645_v49, 0.0  ;;  %vm678_vm12 = vcmp.gt.f32.partialorder %v1446_v37, 1.0  ;;  %v639_v54 = vadd.f32 %v638_v48, %v637_v46  ;;  %v654_v56 = vsel %vm553_vm0, %v653_v43, 0.0 }
  0x4b   : > { %v647_v55 = vrot.slane %v646_v53, 4  ;;  %v663_v57 = vsel %vm553_vm0, %v662_v50, 0.0  ;;  %v617_v58 = vrot.slane %v616_v42, 1  ;;  %v655_v59 = vrot.slane %v654_v56, 4 }
  0x4c   : > { %v664_v60 = vrot.slane %v663_v57, 4  ;;  %v670_v61 = vsel %vm661_vm11, %v1446_v37, 0.0  ;;  %v640_v62 = vrot.slane %v639_v54, 2  ;;  %v679_v3 = vsel %vm678_vm12, 1.0, %v1305_v47 }
  0x4d   : > { %v648_v63 = vadd.f32 %v647_v55, %v646_v53  ;;  %v671_v2 = vsel %vm553_vm0, %v670_v61, 0.0  ;;  %v656_v4 = vadd.f32 %v655_v59, %v654_v56  ;;  %v680_v6 = vsel %vm553_vm0, %v679_v3, 0.0 }
  0x4e   : > { %v665_v0 = vadd.f32 %v664_v60, %v663_v57  ;;  %v672_v5 = vrot.slane %v671_v2, 4  ;;  %v641_v1 = vadd.f32 %v640_v62, %v639_v54  ;;  %v681_v9 = vrot.slane %v680_v6, 4 }
  0x4f   : > { %v649_v7 = vrot.slane %v648_v63, 2  ;;  %v687_v10 = vsel %vm678_vm12, %v1446_v37, 0.0  ;;  %v625_v11 = vrot.slane %v624_v51, 1  ;;  %v657_v8 = vrot.slane %v656_v4, 2 }
  0x50   : > { %v673_v13 = vadd.f32 %v672_v5, %v671_v2  ;;  %v688_v14 = vsel %vm553_vm0, %v687_v10, 0.0  ;;  %v1540_v16 = vadd.f32 %v632_v52, %v631_v38  ;;  %v666_v18 = vrot.slane %v665_v0, 2 }
  0x51   : > { %v682_v19 = vadd.f32 %v681_v9, %v680_v6  ;;  %v689_v20 = vrot.slane %v688_v14, 4  ;;  %v642_v21 = vrot.slane %v641_v1, 1  ;;  %v658_v23 = vadd.f32 %v657_v8, %v656_v4 }
  0x52   : > { %v674_v24 = vrot.slane %v673_v13, 2  ;;  %vm695_vm13 = vcmp.gt.f32.partialorder %v1446_v37, 0.5  ;;  %v1543_v26 = vadd.f32 %v608_v41, %v607_v33  ;;  %v1545_v27 = vadd.f32 %v617_v58, %v616_v42 }
  0x53   : > { %v1547_v31 = vadd.f32 %v649_v7, %v648_v63  ;;  %v690_v32 = vadd.f32 %v689_v20, %v688_v14  ;;  %v1549_v34 = vadd.f32 %v625_v11, %v624_v51  ;;  %v683_v35 = vrot.slane %v682_v19, 2 }
  0x54   : > { %v675_v39 = vadd.f32 %v674_v24, %v673_v13  ;;  %v696_v38 = vsel %vm695_vm13, 1.0, %v1305_v47  ;;  %v634_v46 = vrot.slane %v1540_v16, 1  ;;  %v659_v48 = vrot.slane %v658_v23, 1 }
  0x55   : > { %v691_v49 = vrot.slane %v690_v32, 2  ;;  %v697_v33 = vsel %vm553_vm0, %v696_v38, 0.0  ;;  %v1556_v41 = vadd.f32 %v642_v21, %v641_v1  ;;  %v1558_v42 = vadd.f32 %v666_v18, %v665_v0 }
  0x56   : > { %v676_v43 = vrot.slane %v675_v39, 1  ;;  %v698_v50 = vrot.slane %v697_v33, 4  ;;  %v651_v51 = vrot.slane %v1547_v31, 1  ;;  %v704_v53 = vsel %vm695_vm13, %v1446_v37, 0.0 }
  0x57   : > { %v692_v52 = vadd.f32 %v691_v49, %v690_v32  ;;  %vm712_vm14 = vcmp.gt.f32.partialorder %v1446_v37, 0.25  ;;  %v1565_v54 = vadd.f32 %v683_v35, %v682_v19  ;;  %v705_v56 = vsel %vm553_vm0, %v704_v53, 0.0 }
  0x58   : > { %v699_v55 = vadd.f32 %v698_v50, %v697_v33  ;;  %v713_v57 = vsel %vm712_vm14, 1.0, %v1305_v47  ;;  %v1569_v58 = vadd.f32 %v659_v48, %v658_v23  ;;  %v1571_v59 = vadd.f32 %v676_v43, %v675_v39 }
  0x59   : > { %v706_v60 = vrot.slane %v705_v56, 4  ;;  %v714_v61 = vsel %vm553_vm0, %v713_v57, 0.0  ;;  %v721_v2 = vsel %vm712_vm14, %v1446_v37, 0.0  ;;  %vm729_vm15 = vcmp.gt.f32.partialorder %v1446_v37, 0.125 }
  0x5a   : > { %v700_v62 = vrot.slane %v699_v55, 2  ;;  %v715_v63 = vrot.slane %v714_v61, 4  ;;  %v693_v3 = vrot.slane %v692_v52, 1  ;;  %v722_v0 = vsel %vm553_vm0, %v721_v2, 0.0 }
  0x5b   : > { %v707_v4 = vadd.f32 %v706_v60, %v705_v56  ;;  %v730_v5 = vsel %vm729_vm15, 1.0, %v1305_v47  ;;  %v723_v7 = vrot.slane %v722_v0, 4  ;;  %v738_v8 = vsel %vm729_vm15, %v1446_v37, 0.0 }
  0x5c   : > { %v701_v6 = vadd.f32 %v700_v62, %v699_v55  ;;  %v716_v1 = vadd.f32 %v715_v63, %v714_v61  ;;  %v731_v9 = vsel %vm553_vm0, %v730_v5, 0.0  ;;  %vm746_vm1 = vcmp.gt.f32.partialorder %v1446_v37, 0.0625 }
  0x5d   : > { %v708_v10 = vrot.slane %v707_v4, 2  ;;  %v732_v11 = vrot.slane %v731_v9, 4  ;;  %v724_v18 = vadd.f32 %v723_v7, %v722_v0  ;;  %v739_v19 = vsel %vm553_vm0, %v738_v8, 0.0 }
  0x5e   : > { %v702_v13 = vrot.slane %v701_v6, 1  ;;  %v717_v14 = vrot.slane %v716_v1, 2  ;;  %v740_v23 = vrot.slane %v739_v19, 4  ;;  %v747_v24 = vsel %vm746_vm1, 1.0, %v1305_v47 }
  0x5f   : > { %v709_v20 = vadd.f32 %v708_v10, %v707_v4  ;;  %v733_v21 = vadd.f32 %v732_v11, %v731_v9  ;;  %v1585_v32 = vadd.f32 %v693_v3, %v692_v52  ;;  %v725_v35 = vrot.slane %v724_v18, 2 }
  0x60   : > { %v718_v39 = vadd.f32 %v717_v14, %v716_v1  ;;  %v748_v38 = vsel %vm553_vm0, %v747_v24, 0.0  ;;  %v741_v33 = vadd.f32 %v740_v23, %v739_v19  ;;  %v755_v55 = vsel %vm746_vm1, %v1446_v37, 0.0 }
  0x61   : > { %v710_v48 = vrot.slane %v709_v20, 1  ;;  %v734_v49 = vrot.slane %v733_v21, 2  ;;  %v749_v43 = vrot.slane %v748_v38, 4  ;;  %v726_v53 = vadd.f32 %v725_v35, %v724_v18 }
  0x62   : > { %v719_v50 = vrot.slane %v718_v39, 1  ;;  %vm763_vm2 = vcmp.gt.f32.partialorder %v1446_v37, 0.03125  ;;  %v1592_v56 = vadd.f32 %v702_v13, %v701_v6  ;;  %v742_v57 = vrot.slane %v741_v33, 2 }
  0x63   : > { %v735_v52 = vadd.f32 %v734_v49, %v733_v21  ;;  %v750_v60 = vadd.f32 %v749_v43, %v748_v38  ;;  %v1594_v61 = vadd.f32 %v710_v48, %v709_v20  ;;  %v727_v62 = vrot.slane %v726_v53, 1 }
  0x64   : > { %v756_v63 = vsel %vm553_vm0, %v755_v55, 0.0  ;;  %v764_v2 = vsel %vm763_vm2, 1.0, %v1305_v47  ;;  %v743_v4 = vadd.f32 %v742_v57, %v741_v33  ;;  %v1598_v1 = vadd.f32 %v719_v50, %v718_v39 }
  0x65   : > { %v736_v3 = vrot.slane %v735_v52, 1  ;;  %v751_v0 = vrot.slane %v750_v60, 2  ;;  %v757_v5 = vrot.slane %v756_v63, 4  ;;  %v765_v7 = vsel %vm553_vm0, %v764_v2, 0.0 }
  0x66   : > { %v772_v6 = vsel %vm763_vm2, %v1446_v37, 0.0  ;;  %vm780_vm3 = vcmp.gt.f32.partialorder %v1446_v37, 0.015625  ;;  %v1603_v9 = vadd.f32 %v727_v62, %v726_v53  ;;  %v744_v10 = vrot.slane %v743_v4, 1 }
  0x67   : > { %v752_v11 = vadd.f32 %v751_v0, %v750_v60  ;;  %v758_v8 = vadd.f32 %v757_v5, %v756_v63  ;;  %v766_v13 = vrot.slane %v765_v7, 4  ;;  %v773_v14 = vsel %vm553_vm0, %v772_v6, 0.0 }
  0x68   : > { %v781_v18 = vsel %vm780_vm3, 1.0, %v1305_v47  ;;  %v789_v19 = vsel %vm780_vm3, %v1446_v37, 0.0  ;;  %v1608_v20 = vadd.f32 %v736_v3, %v735_v52  ;;  %v1610_v21 = vadd.f32 %v744_v10, %v743_v4 }
  0x69   : > { %v759_v23 = vrot.slane %v758_v8, 2  ;;  %v774_v24 = vrot.slane %v773_v14, 4  ;;  %v767_v39 = vadd.f32 %v766_v13, %v765_v7  ;;  %v782_v35 = vsel %vm553_vm0, %v781_v18, 0.0 }
  0x6a   : > { %v790_v38 = vsel %vm553_vm0, %v789_v19, 0.0  ;;  %vm797_vm4 = vcmp.gt.f32.partialorder %v1446_v37, 0.0078125  ;;  %v753_v48 = vrot.slane %v752_v11, 1  ;;  %v783_v43 = vrot.slane %v782_v35, 4 }
  0x6b   : > { %v760_v49 = vadd.f32 %v759_v23, %v758_v8  ;;  %v775_v33 = vadd.f32 %v774_v24, %v773_v14  ;;  %v768_v50 = vrot.slane %v767_v39, 2  ;;  %v791_v53 = vrot.slane %v790_v38, 4 }
  0x6c   : > { %v798_v55 = vsel %vm797_vm4, 1.0, %v1305_v47  ;;  %v806_v52 = vsel %vm797_vm4, %v1446_v37, 0.0  ;;  %v784_v62 = vadd.f32 %v783_v43, %v782_v35  ;;  %v1619_v5 = vadd.f32 %v753_v48, %v752_v11 }
  0x6d   : > { %v761_v57 = vrot.slane %v760_v49, 1  ;;  %v776_v60 = vrot.slane %v775_v33, 2  ;;  %v799_v63 = vsel %vm553_vm0, %v798_v55, 0.0  ;;  %v769_v2 = vadd.f32 %v768_v50, %v767_v39 }
  0x6e   : > { %v792_v3 = vadd.f32 %v791_v53, %v790_v38  ;;  %v800_v4 = vrot.slane %v799_v63, 4  ;;  %v807_v0 = vsel %vm553_vm0, %v806_v52, 0.0  ;;  %v785_v6 = vrot.slane %v784_v62, 2 }
  0x6f   : > { %v777_v7 = vadd.f32 %v776_v60, %v775_v33  ;;  %v808_v10 = vrot.slane %v807_v0, 4  ;;  %v770_v8 = vrot.slane %v769_v2, 1  ;;  %vm814_vm5 = vcmp.gt.f32.partialorder %v1446_v37, 0.00390625 }
  0x70   : > { %v793_v13 = vrot.slane %v792_v3, 2  ;;  %v801_v14 = vadd.f32 %v800_v4, %v799_v63  ;;  %v786_v19 = vadd.f32 %v785_v6, %v784_v62  ;;  %v815_v24 = vsel %vm814_vm5, 1.0, %v1305_v47 }
  0x71   : > { %v778_v18 = vrot.slane %v777_v7, 1  ;;  %v809_v23 = vadd.f32 %v808_v10, %v807_v0  ;;  %v1623_v39 = vadd.f32 %v761_v57, %v760_v49  ;;  %v816_v11 = vsel %vm553_vm0, %v815_v24, 0.0 }
  0x72   : > { %v794_v35 = vadd.f32 %v793_v13, %v792_v3  ;;  %v802_v38 = vrot.slane %v801_v14, 2  ;;  %v1626_v48 = vadd.f32 %v770_v8, %v769_v2  ;;  %v787_v33 = vrot.slane %v786_v19, 1 }
  0x73   : > { %v810_v43 = vrot.slane %v809_v23, 2  ;;  %v817_v50 = vrot.slane %v816_v11, 4  ;;  %v823_v52 = vsel %vm814_vm5, %v1446_v37, 0.0  ;;  %vm831_vm6 = vcmp.gt.f32.partialorder %v1446_v37, 0.0 }
  0x74   : > { %v795_v53 = vrot.slane %v794_v35, 1  ;;  %v803_v55 = vadd.f32 %v802_v38, %v801_v14  ;;  %v1630_v60 = vadd.f32 %v778_v18, %v777_v7  ;;  %v824_v57 = vsel %vm553_vm0, %v823_v52, 0.0 }
  0x75   : > { %v811_v62 = vadd.f32 %v810_v43, %v809_v23  ;;  %v818_v49 = vadd.f32 %v817_v50, %v816_v11  ;;  %v1633_v63 = vadd.f32 %v787_v33, %v786_v19  ;;  %v825_v2 = vrot.slane %v824_v57, 4 }
  0x76   : > { %v804_v3 = vrot.slane %v803_v55, 1  ;;  %v832_v4 = vsel %vm831_vm6, 1.0, %v1305_v47  ;;  %v1636_v0 = vadd.f32 %v795_v53, %v794_v35  ;;  %v840_v8 = vsel %vm831_vm6, %v1446_v37, 0.0 }
  0x77   : > { %v819_v6 = vrot.slane %v818_v49, 2  ;;  %v833_v10 = vsel %vm553_vm0, %v832_v4, 0.0  ;;  %v812_v13 = vrot.slane %v811_v62, 1  ;;  %v826_v7 = vadd.f32 %v825_v2, %v824_v57 }
  0x78   : > { %v834_v14 = vrot.slane %v833_v10, 4  ;;  %v841_v18 = vsel %vm553_vm0, %v840_v8, 0.0  ;;  %v1641_v23 = vadd.f32 %v804_v3, %v803_v55  ;;  %v864_v38 = vsel %vm553_vm0, %v1496_v45, 0.0 }
  0x79   : > { %v820_v19 = vadd.f32 %v819_v6, %v818_v49  ;;  %v842_v24 = vrot.slane %v841_v18, 4  ;;  %v827_v47 = vrot.slane %v826_v7, 2  ;;  %v865_v11 = vrot.slane %v864_v38, 4 }
  0x7a   : > { %v835_v35 = vadd.f32 %v834_v14, %v833_v10  ;;  %v872_v33 = vsel %vm553_vm0, %v1499_v12, 0.0  ;;  %v921_v53 = vrot.slane %v1502_v15, 4  ;;  %v947_v57 = vrot.slane %v1508_v40, 4 }
  0x7b   : > { %v821_v37 = vrot.slane %v820_v19, 1  ;;  %v843_v43 = vadd.f32 %v842_v24, %v841_v18  ;;  %v873_v50 = vrot.slane %v872_v33, 4  ;;  %v1648_v55 = vadd.f32 %v827_v47, %v826_v7 }
  0x7c   : > { %v836_v52 = vrot.slane %v835_v35, 2  ;;  %v866_v49 = vadd.f32 %v865_v11, %v864_v38  ;;  %vm975_vm9 = vcmask 1043456   ;;  %v1651_v45 = vadd.f32 %v812_v13, %v811_v62 }
  0x7d   : > { %v844_v3 = vrot.slane %v843_v43, 2  ;;  %v874_v2 = vadd.f32 %v873_v50, %v872_v33  ;;  %v922_v12 = vadd.f32 %v921_v53, %v1502_v15  ;;  %vm977_vm10 = vcmask 1044480  }
  0x7e   : > { %v822_v4 = vadd.f32 %v821_v37, %v820_v19  ;;  %v837_v6 = vadd.f32 %v836_v52, %v835_v35  ;;  %v867_v10 = vrot.slane %v866_v49, 2  ;;  %v948_v8 = vadd.f32 %v947_v57, %v1508_v40 }
  0x7f   : > { %vm979_vm11 = vcmask 1045504   ;;  %v845_v7 = vadd.f32 %v844_v3, %v843_v43  ;;  %v875_v14 = vrot.slane %v874_v2, 2  ;;  %v923_v18 = vrot.slane %v922_v12, 2 }
  0x80   : > { %v962_v24 = vmul.f32 %v1487_v29, %v1417_v25  ;;  %vm981_vm12 = vcmask 1046528   ;;  %v829_v62 = vrot.slane %v1648_v55, 1  ;;  %v838_v13 = vrot.slane %v837_v6, 1 }
  0x81   : > { %v868_v38 = vadd.f32 %v867_v10, %v866_v49  ;;  %v949_v15 = vrot.slane %v948_v8, 2  ;;  %v846_v47 = vrot.slane %v845_v7, 1  ;;  %v876_v11 = vadd.f32 %v875_v14, %v874_v2 }
  0x82   : > { %v924_v19 = vadd.f32 %v923_v18, %v922_v12  ;;  %v963_v35 = vsel %vm553_vm0, %v962_v24, 0.0  ;;  %v839_v40 = vadd.f32 %v838_v13, %v837_v6  ;;  %v972_v53 = vsel %vm553_vm0, %v1490_v30, %v1504_v36 }
  0x83   : > { %v869_v33 = vrot.slane %v868_v38, 1  ;;  %v950_v25 = vadd.f32 %v949_v15, %v948_v8  ;;  %v964_v29 = vrot.slane %v963_v35, 4  ;;  %v847_v37 = vadd.f32 %v846_v47, %v845_v7 }
  0x84   : > { %v877_v43 = vrot.slane %v876_v11, 1  ;;  %v925_v50 = vrot.slane %v924_v19, 1  ;;  %v990_v3 = vsel %vm970_vm8, %v1592_v56, %v1598_v1  ;;  %v997_v10 = vsel %vm970_vm8, %v839_v40, %v1515_v17 }
  0x85   : > { %v870_v52 = vadd.f32 %v869_v33, %v868_v38  ;;  %v951_v49 = vrot.slane %v950_v25, 1  ;;  %v965_v57 = vadd.f32 %v964_v29, %v963_v35  ;;  %v991_v6 = vsel %vm553_vm0, %v990_v3, %v1608_v20  ;;  %1016 = vst [vmem:[%s1663_s19 + $0x28] sm:$0x1] %v847_v37 }
  0x86   : > { %v878_v2 = vadd.f32 %v877_v43, %v876_v11  ;;  %v926_v12 = vadd.f32 %v925_v50, %v924_v19  ;;  %v992_v36 = vsel %vm973_vm7, %v991_v6, %v1619_v5  ;;  %v998_v1 = vsel %vm553_vm0, %v997_v10, %v1543_v26 }
  0x87   : > { %v952_v8 = vadd.f32 %v951_v49, %v950_v25  ;;  %v966_v7 = vrot.slane %v965_v57, 2  ;;  %v974_v30 = vsel %vm973_vm7, %v972_v53, %v870_v52  ;;  %v993_v56 = vsel %vm975_vm9, %v992_v36, %v1626_v48 }
  0x88   : > { %v976_v14 = vsel %vm975_vm9, %v974_v30, %v878_v2  ;;  %v1004_v17 = vsel %vm970_vm8, %v1594_v61, %v1603_v9  ;;  %v994_v5 = vsel %vm977_vm10, %v993_v56, %v1633_v63  ;;  %v999_v24 = vsel %vm973_vm7, %v998_v1, %v1549_v34 }
  0x89   : > { %v967_v20 = vadd.f32 %v966_v7, %v965_v57  ;;  %v978_v18 = vsel %vm977_vm10, %v976_v14, %v1483_v28  ;;  %v995_v26 = vsel %vm979_vm11, %v994_v5, %v1641_v23  ;;  %v1000_v61 = vsel %vm975_vm9, %v999_v24, %v1556_v41 }
  0x8a   : > { %v980_v48 = vsel %vm979_vm11, %v978_v18, %v926_v12  ;;  %v1005_v9 = vsel %vm553_vm0, %v1004_v17, %v1610_v21  ;;  %v996_v63 = vsel %vm981_vm12, %v995_v26, %v822_v4  ;;  %v1001_v34 = vsel %vm977_vm10, %v1000_v61, %v1569_v58 }
  0x8b   : > { %v968_v13 = vrot.slane %v967_v20, 1  ;;  %v982_v28 = vsel %vm981_vm12, %v980_v48, %v952_v8  ;;  %v668_v38 = vrot.slane %v1558_v42, 1  ;;  %v830_v15 = vadd.f32 %v829_v62, %v1648_v55  ;;  %1013 = vst [vmem:[%s1663_s19 + $0x10] sm:$0xff] %v996_v63 }
  0x8c   : > { %v1002_v23 = vsel %vm979_vm11, %v1001_v34, %v1571_v59  ;;  %v1006_v41 = vsel %vm973_vm7, %v1005_v9, %v1623_v39  ;;  %1011 = vst [vmem:[%s1663_s19] sm:$0xff] %v982_v28  ;;  %v685_v21 = vrot.slane %v1565_v54, 1  ;;  %v635_v55 = vadd.f32 %v634_v46, %v1540_v16 }
  0x8d   : > { %v969_v47 = vadd.f32 %v968_v13, %v967_v20  ;;  %v1003_v4 = vsel %vm981_vm12, %v1002_v23, %v1585_v32  ;;  %v1007_v58 = vsel %vm975_vm9, %v1006_v41, %v1630_v60  ;;  %v652_v39 = vadd.f32 %v651_v51, %v1547_v31 }
  0x8e   : > { %v1008_v59 = vsel %vm977_vm10, %v1007_v58, %v1636_v0  ;;  %1014 = vst [vmem:[%s1663_s19 + $0x18] sm:$0xff] %v1003_v4  ;;  %v669_v60 = vadd.f32 %v668_v38, %v1558_v42  ;;  %v686_v0 = vadd.f32 %v685_v21, %v1565_v54 }
  0x8f   : > { %v983_v62 = vsel %vm970_vm8, %v969_v47, %v1510_v44  ;;  %v1009_v32 = vsel %vm979_vm11, %v1008_v59, %v1651_v45 }
  0x90   : > { %v984_v16 = vsel %vm553_vm0, %v983_v62, %v1517_v22  ;;  %v1010_v46 = vsel %vm981_vm12, %v1009_v32, %v830_v15 }
  0x91   : > { %v985_v11 = vsel %vm973_vm7, %v984_v16, %v1545_v27  ;;  %1015 = vst [vmem:[%s1663_s19 + $0x20] sm:$0xff] %v1010_v46 }
  0x92   : > { %v986_v31 = vsel %vm975_vm9, %v985_v11, %v635_v55 }
  0x93   : > { %v987_v44 = vsel %vm977_vm10, %v986_v31, %v652_v39 }
  0x94   : > { %v988_v51 = vsel %vm979_vm11, %v987_v44, %v669_v60 }
  0x95   : > { %v989_v45 = vsel %vm981_vm12, %v988_v51, %v686_v0 }
  0x96   : > { %1012 = vst [vmem:[%s1663_s19 + $0x8] sm:$0xff] %v989_v45 }
  0x97 PF: > { %s18_s29 = sadd.s32 1, %s1303_s29   ;;  %s1761_s27 = smov %s1299_s28 }
  0x98   : > { %p15_p5 = scmp.ge.s32.totalorder %s18_s29, 4   ;;  %s1762_s28 = smov %s1764_s30 }
  0x9a   :  { %17 = sbr.rel (!%p15_p5) target bundleno = 2 (0x2), region = 108 }

</bundles_post_ra>
